<compile_context>
chip_gen: v5e
topology: v5e:2x2
jax: 0.10.0
libtpu: 0.0.40
codegen_flags: <defaults>
</compile_context>

<pallas_src>
from functools import partial

import jax
import jax.numpy as jnp
from jax.experimental import pallas as pl
from jax.experimental.pallas import tpu as pltpu

HIDDEN = 512    # fc1 / fc2 width
STREAM = 256    # fc_value / fc_advantage width
ACT_PAD = 128   # lane-dense padded action dimension (n_actions <= 128)


def dueling_q_kernel(x_ref, w1_ref, w2_ref, w3_ref, wq_ref, b_ref, q_ref):
    """Fused forward: fc1 -> fc2 -> [fc_value|fc_advantage] -> folded dueling head."""
    # fc1 + ReLU   (dropout1 == identity in eval mode)
    h1 = jnp.dot(x_ref[...], w1_ref[...], preferred_element_type=jnp.float32) + b_ref[0:1, :]
    h1 = jnp.maximum(h1, 0.0).astype(jnp.bfloat16)

    # fc2 + ReLU   (dropout2 == identity in eval mode)
    h2 = jnp.dot(h1, w2_ref[...], preferred_element_type=jnp.float32) + b_ref[1:2, :]
    h2 = jnp.maximum(h2, 0.0).astype(jnp.bfloat16)

    # fused stream layer: [vh | ah] = relu(h2 @ [wfv | wfa] + [bfv | bfa])
    h3 = jnp.dot(h2, w3_ref[...], preferred_element_type=jnp.float32) + b_ref[2:3, :]
    h3 = jnp.maximum(h3, 0.0).astype(jnp.bfloat16)

    # folded dueling head: Q = V + (A - mean_a A) == [vh|ah] @ W_q + b_q
    # (columns n_actions..127 of wq / bias row 3 are zero -> padded Q cols are 0)
    q_ref[...] = (jnp.dot(h3, wq_ref[...], preferred_element_type=jnp.float32)
                  + b_ref[3:4, 0:ACT_PAD])


def pack_params(p):
    """Pack PyTorch-style f32 params into consolidated bf16/f32 kernel operands."""
    A = p["wa"].shape[1]
    assert A <= ACT_PAD, "n_actions must be <= 128 for the lane-dense packed head"

    w1 = p["w1"].astype(jnp.bfloat16)                                     # (D, 512)
    w2 = p["w2"].astype(jnp.bfloat16)                                     # (512, 512)
    w3 = jnp.concatenate([p["wfv"], p["wfa"]], axis=1).astype(jnp.bfloat16)  # (512, 512)

    # Fold value head, advantage head and the mean-subtraction into one weight
    # (done in f32 BEFORE the bf16 cast), then zero-pad actions to 128 lanes.
    wa_centered = p["wa"] - p["wa"].mean(axis=1, keepdims=True)           # (256, A)
    wq_logical = jnp.concatenate(
        [jnp.broadcast_to(p["wv"], (STREAM, A)), wa_centered], axis=0)    # (512, A)
    wq = jnp.zeros((2 * STREAM, ACT_PAD), jnp.float32)
    wq = wq.at[:, :A].set(wq_logical).astype(jnp.bfloat16)                # (512, 128)

    bq = p["bv"] + (p["ba"] - p["ba"].mean(axis=1, keepdims=True))        # (1, A)

    # One f32 bias slab: rows = [b1, b2, bfv|bfa, bq (zero-padded)].
    b_all = jnp.zeros((4, HIDDEN), jnp.float32)
    b_all = b_all.at[0, :].set(p["b1"][0])
    b_all = b_all.at[1, :].set(p["b2"][0])
    b_all = b_all.at[2, :STREAM].set(p["bfv"][0])
    b_all = b_all.at[2, STREAM:].set(p["bfa"][0])
    b_all = b_all.at[3, :A].set(bq[0])

    return {"w1": w1, "w2": w2, "w3": w3, "wq": wq, "b": b_all}


@partial(jax.jit, static_argnames=("n_actions",))
def dueling_q_forward(x, packed, n_actions):
    """x: (B, input_dims) f32; packed: output of pack_params. Returns (B, n_actions) f32."""
    B, D = x.shape

    # Cast activations to bf16 in the wrapper (halves x DMA, removes in-kernel cast).
    x = x.astype(jnp.bfloat16)

    # Pad batch to a sublane multiple and tile it with a 1-D (parallel) grid.
    TB_MAX = 512
    b_pad = ((B + 7) // 8) * 8
    if b_pad <= TB_MAX:
        tb = b_pad                       # single grid step for small batches
    else:
        tb = TB_MAX                      # >=2 steps -> both v7x TensorCores used
        b_pad = ((B + tb - 1) // tb) * tb
    if b_pad != B:
        x = jnp.pad(x, ((0, b_pad - B), (0, 0)))

    grid = (b_pad // tb,)

    # Advisory cost estimate so XLA can schedule surrounding ops around the call.
    flops = 2 * b_pad * (D * HIDDEN + HIDDEN * HIDDEN + HIDDEN * HIDDEN + HIDDEN * ACT_PAD)
    bytes_accessed = (
        b_pad * D * 2                                                   # x (bf16)
        + 2 * (packed["w1"].size + packed["w2"].size
               + packed["w3"].size + packed["wq"].size)                 # bf16 weights
        + packed["b"].size * 4                                          # f32 bias slab
        + b_pad * ACT_PAD * 4)                                          # f32 output

    q = pl.pallas_call(
        dueling_q_kernel,
        out_shape=jax.ShapeDtypeStruct((b_pad, ACT_PAD), jnp.float32),
        grid_spec=pltpu.PrefetchScalarGridSpec(
            num_scalar_prefetch=0,
            grid=grid,
            in_specs=[
                pl.BlockSpec((tb, D), lambda i: (i, 0)),                  # x tile
                pl.BlockSpec((D, HIDDEN), lambda i: (0, 0)),              # w1     (resident)
                pl.BlockSpec((HIDDEN, HIDDEN), lambda i: (0, 0)),         # w2     (resident)
                pl.BlockSpec((HIDDEN, 2 * STREAM), lambda i: (0, 0)),     # wfv|wfa (resident)
                pl.BlockSpec((2 * STREAM, ACT_PAD), lambda i: (0, 0)),    # folded head (resident)
                pl.BlockSpec((4, HIDDEN), lambda i: (0, 0)),              # bias slab (resident)
            ],
            out_specs=pl.BlockSpec((tb, ACT_PAD), lambda i: (i, 0)),      # lane-dense output
        ),
        compiler_params=pltpu.CompilerParams(
            dimension_semantics=("parallel",)),
        cost_estimate=pl.CostEstimate(
            flops=flops, transcendentals=0, bytes_accessed=bytes_accessed),
    )(x, packed["w1"], packed["w2"], packed["w3"], packed["wq"], packed["b"])

    return q[:B, :n_actions]


def init_params(key, input_dims, n_actions):
    """Deterministic PyTorch-style init. Weights stored as (in, out), f32."""
    def linear(key, fan_in, fan_out):
        kw, kb = jax.random.split(key)
        bound = 1.0 / jnp.sqrt(jnp.float32(fan_in))
        w = jax.random.uniform(kw, (fan_in, fan_out), jnp.float32, -bound, bound)
        b = jax.random.uniform(kb, (1, fan_out), jnp.float32, -bound, bound)
        return w, b

    keys = jax.random.split(key, 6)
    p = {}
    p["w1"], p["b1"] = linear(keys[0], input_dims, HIDDEN)
    p["w2"], p["b2"] = linear(keys[1], HIDDEN, HIDDEN)
    p["wfv"], p["bfv"] = linear(keys[2], HIDDEN, STREAM)
    p["wv"], p["bv"] = linear(keys[3], STREAM, 1)
    p["wfa"], p["bfa"] = linear(keys[4], HIDDEN, STREAM)
    p["wa"], p["ba"] = linear(keys[5], STREAM, n_actions)
    return p


def reference_forward(x, p):
    """Pure-JAX f32 reference matching the PyTorch module exactly (eval mode)."""
    h1 = jax.nn.relu(x @ p["w1"] + p["b1"])
    h2 = jax.nn.relu(h1 @ p["w2"] + p["b2"])
    vh = jax.nn.relu(h2 @ p["wfv"] + p["bfv"])
    val = vh @ p["wv"] + p["bv"]
    ah = jax.nn.relu(h2 @ p["wfa"] + p["bfa"])
    adv = ah @ p["wa"] + p["ba"]
    return val + (adv - adv.mean(axis=1, keepdims=True))


if __name__ == "__main__":
    input_dims = 32
    n_actions = 6

    key = jax.random.PRNGKey(0)
    kx, kp, kx2 = jax.random.split(key, 3)
    params = init_params(kp, input_dims, n_actions)
    packed = pack_params(params)   # pack once; reuse across calls (weights stay hot under jit)

    # Small batch (single grid step).
    batch = 4
    x = jax.random.normal(kx, (batch, input_dims), jnp.float32)
    q = jax.block_until_ready(dueling_q_forward(x, packed, n_actions))
    q_ref = reference_forward(x, params)
    assert q.shape == (batch, n_actions)
    # bf16 weights/activations (f32 accumulation) => loosened tolerance vs f32 reference.
    assert jnp.allclose(q, q_ref, atol=2e-2, rtol=2e-2), "small-batch mismatch vs reference"

    # Larger batch: exercises batch padding + the multi-step (tb=512) grid path,
    # and validates max-abs error on a bigger random sample.
    batch2 = 600
    x2 = jax.random.normal(kx2, (batch2, input_dims), jnp.float32)
    q2 = jax.block_until_ready(dueling_q_forward(x2, packed, n_actions))
    q2_ref = reference_forward(x2, params)
    assert q2.shape == (batch2, n_actions)
    max_abs_err = float(jnp.max(jnp.abs(q2 - q2_ref)))
    assert max_abs_err < 5e-2, f"large-batch max-abs error too high: {max_abs_err}"

    print("KERNEL_OK")
</pallas_src>

<mosaic_0001>
module attributes {stable_mosaic.version = 11 : i64} {
  func.func @dueling_q_kernel(%arg0: i32, %arg1: memref<8x32xbf16, #tpu.memory_space<vmem>>, %arg2: memref<32x512xbf16, #tpu.memory_space<vmem>>, %arg3: memref<512x512xbf16, #tpu.memory_space<vmem>>, %arg4: memref<512x512xbf16, #tpu.memory_space<vmem>>, %arg5: memref<512x128xbf16, #tpu.memory_space<vmem>>, %arg6: memref<4x512xf32, #tpu.memory_space<vmem>>, %arg7: memref<8x128xf32, #tpu.memory_space<vmem>>) attributes {dimension_semantics = [#tpu.dimension_semantics<parallel>], iteration_bounds = array<i64: 1>, scalar_prefetch = 0 : i64, scratch_operands = 0 : i64, tpu.core_type = #tpu.core_type<tc>, window_params = [{transform_indices = @transform_0, window_bounds = array<i64: 8, 32>}, {pipeline_mode = #tpu.pipeline_mode<synchronous>, transform_indices = @transform_1, window_bounds = array<i64: 32, 512>}, {pipeline_mode = #tpu.pipeline_mode<synchronous>, transform_indices = @transform_2, window_bounds = array<i64: 512, 512>}, {pipeline_mode = #tpu.pipeline_mode<synchronous>, transform_indices = @transform_3, window_bounds = array<i64: 512, 512>}, {pipeline_mode = #tpu.pipeline_mode<synchronous>, transform_indices = @transform_4, window_bounds = array<i64: 512, 128>}, {pipeline_mode = #tpu.pipeline_mode<synchronous>, transform_indices = @transform_5, window_bounds = array<i64: 4, 512>}, {transform_indices = @transform_6, window_bounds = array<i64: 8, 128>}]} {
    %c0 = arith.constant 0 : index
    %c0_0 = arith.constant 0 : index
    %0 = vector.load %arg1[%c0, %c0_0] : memref<8x32xbf16, #tpu.memory_space<vmem>>, vector<8x32xbf16>
    %c0_1 = arith.constant 0 : index
    %c0_2 = arith.constant 0 : index
    %1 = vector.load %arg2[%c0_1, %c0_2] : memref<32x512xbf16, #tpu.memory_space<vmem>>, vector<32x512xbf16>
    %cst = arith.constant dense<0.000000e+00> : vector<8x512xf32>
    %2 = tpu.matmul %0, %1, %cst {dimension_numbers = #tpu.dot_dimension_numbers<[1], [0], [0], [1], [0, 0, 1, 1], [], []>} : vector<8x32xbf16>, vector<32x512xbf16>, vector<8x512xf32> -> vector<8x512xf32>
    %c0_3 = arith.constant 0 : index
    %c0_4 = arith.constant 0 : index
    %3 = vector.load %arg6[%c0_3, %c0_4] : memref<4x512xf32, #tpu.memory_space<vmem>>, vector<1x512xf32>
    %4 = vector.broadcast %3 : vector<1x512xf32> to vector<8x512xf32>
    %5 = arith.addf %2, %4 : vector<8x512xf32>
    %cst_5 = arith.constant 0.000000e+00 : f32
    %6 = vector.broadcast %cst_5 : f32 to vector<8x512xf32>
    %7 = arith.maximumf %5, %6 : vector<8x512xf32>
    %8 = arith.truncf %7 : vector<8x512xf32> to vector<8x512xbf16>
    %c0_6 = arith.constant 0 : index
    %c0_7 = arith.constant 0 : index
    %9 = vector.load %arg3[%c0_6, %c0_7] : memref<512x512xbf16, #tpu.memory_space<vmem>>, vector<512x512xbf16>
    %cst_8 = arith.constant dense<0.000000e+00> : vector<8x512xf32>
    %10 = tpu.matmul %8, %9, %cst_8 {dimension_numbers = #tpu.dot_dimension_numbers<[1], [0], [0], [1], [0, 0, 1, 1], [], []>} : vector<8x512xbf16>, vector<512x512xbf16>, vector<8x512xf32> -> vector<8x512xf32>
    %c1 = arith.constant 1 : index
    %c0_9 = arith.constant 0 : index
    %11 = vector.load %arg6[%c1, %c0_9] : memref<4x512xf32, #tpu.memory_space<vmem>>, vector<1x512xf32>
    %12 = vector.broadcast %11 : vector<1x512xf32> to vector<8x512xf32>
    %13 = arith.addf %10, %12 : vector<8x512xf32>
    %cst_10 = arith.constant 0.000000e+00 : f32
    %14 = vector.broadcast %cst_10 : f32 to vector<8x512xf32>
    %15 = arith.maximumf %13, %14 : vector<8x512xf32>
    %16 = arith.truncf %15 : vector<8x512xf32> to vector<8x512xbf16>
    %c0_11 = arith.constant 0 : index
    %c0_12 = arith.constant 0 : index
    %17 = vector.load %arg4[%c0_11, %c0_12] : memref<512x512xbf16, #tpu.memory_space<vmem>>, vector<512x512xbf16>
    %cst_13 = arith.constant dense<0.000000e+00> : vector<8x512xf32>
    %18 = tpu.matmul %16, %17, %cst_13 {dimension_numbers = #tpu.dot_dimension_numbers<[1], [0], [0], [1], [0, 0, 1, 1], [], []>} : vector<8x512xbf16>, vector<512x512xbf16>, vector<8x512xf32> -> vector<8x512xf32>
    %c2 = arith.constant 2 : index
    %c0_14 = arith.constant 0 : index
    %19 = vector.load %arg6[%c2, %c0_14] : memref<4x512xf32, #tpu.memory_space<vmem>>, vector<1x512xf32>
    %20 = vector.broadcast %19 : vector<1x512xf32> to vector<8x512xf32>
    %21 = arith.addf %18, %20 : vector<8x512xf32>
    %cst_15 = arith.constant 0.000000e+00 : f32
    %22 = vector.broadcast %cst_15 : f32 to vector<8x512xf32>
    %23 = arith.maximumf %21, %22 : vector<8x512xf32>
    %24 = arith.truncf %23 : vector<8x512xf32> to vector<8x512xbf16>
    %c0_16 = arith.constant 0 : index
    %c0_17 = arith.constant 0 : index
    %25 = vector.load %arg5[%c0_16, %c0_17] : memref<512x128xbf16, #tpu.memory_space<vmem>>, vector<512x128xbf16>
    %cst_18 = arith.constant dense<0.000000e+00> : vector<8x128xf32>
    %26 = tpu.matmul %24, %25, %cst_18 {dimension_numbers = #tpu.dot_dimension_numbers<[1], [0], [0], [1], [0, 0, 1, 1], [], []>} : vector<8x512xbf16>, vector<512x128xbf16>, vector<8x128xf32> -> vector<8x128xf32>
    %c3 = arith.constant 3 : index
    %c0_19 = arith.constant 0 : index
    %27 = vector.load %arg6[%c3, %c0_19] : memref<4x512xf32, #tpu.memory_space<vmem>>, vector<1x128xf32>
    %28 = vector.broadcast %27 : vector<1x128xf32> to vector<8x128xf32>
    %29 = arith.addf %26, %28 : vector<8x128xf32>
    %c0_20 = arith.constant 0 : index
    %c0_21 = arith.constant 0 : index
    %30 = vector.load %arg7[%c0_20, %c0_21] : memref<8x128xf32, #tpu.memory_space<vmem>>, vector<8x128xf32>
    tpu.vector_store %arg7[%c0_20, %c0_21], %29 {strides = array<i32>} : memref<8x128xf32, #tpu.memory_space<vmem>>, vector<8x128xf32>,
    return
  }
  func.func @transform_0(%arg0: i32) -> (i32, i32) {
    %c0_i32 = arith.constant 0 : i32
    %c0_i32_0 = arith.constant 0 : i32
    return %arg0, %c0_i32 : i32, i32
  }
  func.func @transform_1(%arg0: i32) -> (i32, i32) {
    %c0_i32 = arith.constant 0 : i32
    %c0_i32_0 = arith.constant 0 : i32
    %c0_i32_1 = arith.constant 0 : i32
    return %c0_i32, %c0_i32_0 : i32, i32
  }
  func.func @transform_2(%arg0: i32) -> (i32, i32) {
    %c0_i32 = arith.constant 0 : i32
    %c0_i32_0 = arith.constant 0 : i32
    %c0_i32_1 = arith.constant 0 : i32
    return %c0_i32, %c0_i32_0 : i32, i32
  }
  func.func @transform_3(%arg0: i32) -> (i32, i32) {
    %c0_i32 = arith.constant 0 : i32
    %c0_i32_0 = arith.constant 0 : i32
    %c0_i32_1 = arith.constant 0 : i32
    return %c0_i32, %c0_i32_0 : i32, i32
  }
  func.func @transform_4(%arg0: i32) -> (i32, i32) {
    %c0_i32 = arith.constant 0 : i32
    %c0_i32_0 = arith.constant 0 : i32
    %c0_i32_1 = arith.constant 0 : i32
    return %c0_i32, %c0_i32_0 : i32, i32
  }
  func.func @transform_5(%arg0: i32) -> (i32, i32) {
    %c0_i32 = arith.constant 0 : i32
    %c0_i32_0 = arith.constant 0 : i32
    %c0_i32_1 = arith.constant 0 : i32
    return %c0_i32, %c0_i32_0 : i32, i32
  }
  func.func @transform_6(%arg0: i32) -> (i32, i32) {
    %c0_i32 = arith.constant 0 : i32
    %c0_i32_0 = arith.constant 0 : i32
    return %arg0, %c0_i32 : i32, i32
  }
}

</mosaic_0001>

<bundles_post_ra>
// kernel: dueling_q_forward.1
= control target key start
LH: loop header
LB: loop body
LE: loop exit
PB: predicated region body
PF: predicated region fallthrough
CT: control target
= control target key end

     0   :  { %11 = vsyncpa [#allocation3], 0  ;;  %s4292_s0 = inlined_call_operand.vmem [shape: bf16[8,32], index: 0, kind: input, shape index: {}]   ;;  %s4293_s1 = inlined_call_operand.hbm [shape: bf16[32,512], index: 1, kind: input, shape index: {}]   ;;  %s4294_s2 = inlined_call_operand.hbm [shape: bf16[512,512], index: 2, kind: input, shape index: {}]   ;;  %s4295_s3 = inlined_call_operand.hbm [shape: bf16[512,512], index: 3, kind: input, shape index: {}]   ;;  %s4296_s4 = inlined_call_operand.hbm [shape: bf16[512,128], index: 4, kind: input, shape index: {}]   ;;  %s4297_s5 = inlined_call_operand.hbm [shape: f32[4,512], index: 5, kind: input, shape index: {}]   ;;  %s4298_s6 = inlined_call_operand.vmem [shape: f32[8,128], index: 6, kind: output, shape index: {}]  }
   0x1   :  { %12 = vsyncpa [#allocation5], 0 }
   0x2   :  { %13 = vsyncpa [#allocation8], 0  ;;  %s33_s23 = sshll.u32 %s4294_s2, 4  ;;  %s4151_s24 = smov [#allocation4]   ;;  %s34_s23 = int_to_ptr.hbm [resolvable:$true] %s33_s23 }
   0x3   :  { %s35_s25 = sshll.u32 %s4151_s24, 4  ;;  %s59_s28 = sshll.u32 %s4296_s4, 4  ;;  %s36_s25 = int_to_ptr.vmem [resolvable:$true] %s35_s25  ;;  %s60_s28 = int_to_ptr.hbm [resolvable:$true] %s59_s28 }
   0x4   :  { %s4152_s29 = smov 256   ;;  %s4153_s30 = smov 16  }
   0x5   :  { %41 = dma.hbm_to_vmem [thread:$0]  %s34_s23, 16384, %s36_s25, [#allocation5], %s4152_s29, %s4152_s29, %s4153_s30  }
   0x6   :  { %s4154_s7 = smov [#allocation7]   ;;  %s4155_s9 = smov 64  }
   0x7   :  { %s61_s8 = sshll.u32 %s4154_s7, 4  ;;  %s4156_s10 = smov 4   ;;  %s62_s8 = int_to_ptr.vmem [resolvable:$true] %s61_s8 }
   0x8   :  { %67 = dma.hbm_to_vmem [thread:$0]  %s60_s28, 4096, %s62_s8, [#allocation8], %s4155_s9, %s4155_s9, %s4156_s10  }
   0x9   :  { %s20_s12 = sshll.u32 %s4293_s1, 4  ;;  %s4157_s13 = smov [#allocation2]   ;;  %s21_s12 = int_to_ptr.hbm [resolvable:$true] %s20_s12 }
   0xa   :  { %s22_s14 = sshll.u32 %s4157_s13, 4  ;;  %s46_s16 = sshll.u32 %s4295_s3, 4  ;;  %s23_s14 = int_to_ptr.vmem [resolvable:$true] %s22_s14  ;;  %s47_s16 = int_to_ptr.hbm [resolvable:$true] %s46_s16 }
   0xb   :  { %28 = dma.hbm_to_vmem [thread:$0]  %s21_s12, 1024, %s23_s14, [#allocation3], %s4152_s29, %s4152_s29, %s4153_s30  }
   0xc   :  { %s4158_s17 = smov [#allocation6]   ;;  %s73_s21 = sshll.u32 %s4297_s5, 4  ;;  %s74_s21 = int_to_ptr.hbm [resolvable:$true] %s73_s21 }
   0xd   :  { %s48_s18 = sshll.u32 %s4158_s17, 4  ;;  %s4159_s1 = smov [#allocation9]   ;;  %s49_s18 = int_to_ptr.vmem [resolvable:$true] %s48_s18 }
   0xe   :  { %54 = dma.hbm_to_vmem [thread:$0]  %s47_s16, 16384, %s49_s18, [#allocation5], %s4152_s29, %s4152_s29, %s4153_s30  }
   0xf   :  { %s75_s22 = sshll.u32 %s4159_s1, 4  ;;  %s76_s22 = int_to_ptr.vmem [resolvable:$true] %s75_s22 }
  0x10   :  { %78 = dma.hbm_to_vmem [thread:$0]  %s74_s21, 256, %s76_s22, [#allocation8]  }
  0x11   :  { %4145 = dma.done.wait [#allocation3], 1024  }
  0x12   :  { %4146 = vsyncadd [#allocation3], 4294966272 }
  0x13   :  { %4147 = dma.done.wait [#allocation5], 32768  }
  0x14   :  { %4148 = vsyncadd [#allocation5], 4294934528 }
  0x15   :  { %4149 = dma.done.wait [#allocation8], 4352  }
  0x16   :  { %4150 = vsyncadd [#allocation8], 4294962944  ;;  %vm159_vm0 = vcmask 261120   ;;  %v2549_v0 = vld [vmem:[#allocation2 + $0x20] sm:$0xf] }
  0x17   :  { %v3725_v1 = vld [vmem:[#allocation2 + $0x2c] sm:$0xf0]  ;;  %v3723_v2 = vld [vmem:[#allocation2 + $0x24] sm:$0xf]  ;;  %v2551_v4 = vld [vmem:[#allocation2 + $0x30] sm:$0xf0] }
  0x18   :  { %v2550_v3 = vor.u32 %v3725_v1, %v2549_v0  ;;  %v2557_v5 = vld [vmem:[#allocation2 + $0x28] sm:$0xf]  ;;  %v3726_v6 = vld [vmem:[#allocation2 + $0x34] sm:$0xf0]  ;;  %v2554_v7 = vor.u32 %v3723_v2, %v2551_v4  ;;  %v3724_v9 = vld [vmem:[#allocation2 + $0x2c] sm:$0xf] }
  0x19   :  { %v2558_v8 = vor.u32 %v3726_v6, %v2557_v5  ;;  %v2559_v10 = vld [vmem:[#allocation2 + $0x38] sm:$0xf0]  ;;  %v2533_v11 = vld [vmem:[#allocation2] sm:$0xf]  ;;  %v3721_v13 = vld [vmem:[#allocation2 + $0xc] sm:$0xf0] }
  0x1a   :  { %169 = vmatpush.bf16.msra.mxu0 %v2550_v3  ;;  %v2562_v12 = vor.u32 %v3724_v9, %v2559_v10  ;;  %v3719_v14 = vld [vmem:[#allocation2 + $0x4] sm:$0xf]  ;;  %v2535_v15 = vld [vmem:[#allocation2 + $0x10] sm:$0xf0]  ;;  %182 = vmatpush.bf16.msra.mxu1 %v2554_v7  ;;  %v2534_v16 = vor.u32 %v3721_v13, %v2533_v11  ;;  %v2541_v18 = vld [vmem:[#allocation2 + $0x8] sm:$0xf] }
  0x1b   :  { %195 = vmatpush.bf16.msra.mxu2 %v2558_v8  ;;  %v2538_v17 = vor.u32 %v3719_v14, %v2535_v15  ;;  %v3722_v19 = vld [vmem:[#allocation2 + $0x14] sm:$0xf0]  ;;  %v3720_v20 = vld [vmem:[#allocation2 + $0xc] sm:$0xf]  ;;  %v2543_v22 = vld [vmem:[#allocation2 + $0x18] sm:$0xf0] }
  0x1c   :  { %208 = vmatpush.bf16.msra.mxu3 %v2562_v12  ;;  %v2542_v21 = vor.u32 %v3722_v19, %v2541_v18  ;;  %v100_v23 = vld [vmem:[%s4292_s0] sm:$0xf]  ;;  %v2546_v25 = vor.u32 %v3720_v20, %v2543_v22  ;;  %v3757_v26 = vld [vmem:[#allocation4 + $0xec] sm:$0xf0] }
  0x1d   :  { %v2681_v24 = vld [vmem:[#allocation4 + $0xe0] sm:$0xf]  ;;  %v3789_v28 = vld [vmem:[#allocation4 + $0x1ec] sm:$0xf0] }
  0x1e   :  { %v2809_v27 = vld [vmem:[#allocation4 + $0x1e0] sm:$0xf]  ;;  %170 = vmatpush.bf16.msra.mxu0 %v2534_v16  ;;  %v2682_v29 = vor.u32 %v3757_v26, %v2681_v24  ;;  %v3753_v32 = vld [vmem:[#allocation4 + $0xcc] sm:$0xf0]  ;;  %183 = vmatpush.bf16.msra.mxu1 %v2538_v17 }
  0x1f   :  { %v2810_v30 = vor.u32 %v3789_v28, %v2809_v27  ;;  %v2665_v31 = vld [vmem:[#allocation4 + $0xc0] sm:$0xf]  ;;  %196 = vmatpush.bf16.msra.mxu2 %v2542_v21  ;;  %v3785_v34 = vld [vmem:[#allocation4 + $0x1cc] sm:$0xf0] }
  0x20   :  { %v2793_v33 = vld [vmem:[#allocation4 + $0x1c0] sm:$0xf]  ;;  %v3821_v36 = vld [vmem:[#allocation4 + $0x2ec] sm:$0xf0]  ;;  %209 = vmatpush.bf16.msra.mxu3 %v2546_v25  ;;  %v2666_v37 = vor.u32 %v3753_v32, %v2665_v31 }
  0x21   :  { %v2937_v35 = vld [vmem:[#allocation4 + $0x2e0] sm:$0xf]  ;;  %v3853_v40 = vld [vmem:[#allocation4 + $0x3ec] sm:$0xf0]  ;;  %2563 = vmatmul.msk.bf16.vlgmr.msra.gmra.mxu0 %vm159_vm0, %v100_v23  ;;  %v2794_v42 = vor.u32 %v3785_v34, %v2793_v33  ;;  %2564 = vmatmul.msk.bf16.vlgmr.msra.gmra.mxu1 %vm159_vm0, %v100_v23 }
  0x22   :  { %1002 = vmatpush.bf16.msrb.mxu0 %v2682_v29  ;;  %v2938_v38 = vor.u32 %v3821_v36, %v2937_v35  ;;  %v3065_v39 = vld [vmem:[#allocation4 + $0x3e0] sm:$0xf]  ;;  %1015 = vmatpush.bf16.msrb.mxu1 %v2810_v30  ;;  %v3749_v44 = vld [vmem:[#allocation4 + $0xac] sm:$0xf0] }
  0x23   :  { %v2649_v41 = vld [vmem:[#allocation4 + $0xa0] sm:$0xf]  ;;  %v3066_v43 = vor.u32 %v3853_v40, %v3065_v39  ;;  %v3781_v46 = vld [vmem:[#allocation4 + $0x1ac] sm:$0xf0]  ;;  %2565 = vmatmul.msk.bf16.vlgmr.msra.gmra.mxu2 %vm159_vm0, %v100_v23  ;;  %2566 = vmatmul.msk.bf16.vlgmr.msra.gmra.mxu3 %vm159_vm0, %v100_v23 }
  0x24   :  { %v2777_v45 = vld [vmem:[#allocation4 + $0x1a0] sm:$0xf]  ;;  %v3817_v48 = vld [vmem:[#allocation4 + $0x2cc] sm:$0xf0]  ;;  %1028 = vmatpush.bf16.msrb.mxu2 %v2938_v38  ;;  %v2650_v52 = vor.u32 %v3749_v44, %v2649_v41 }
  0x25   :  { %v2921_v47 = vld [vmem:[#allocation4 + $0x2c0] sm:$0xf]  ;;  %v3849_v51 = vld [vmem:[#allocation4 + $0x3cc] sm:$0xf0]  ;;  %1041 = vmatpush.bf16.msrb.mxu3 %v3066_v43  ;;  %v2778_v57 = vor.u32 %v3781_v46, %v2777_v45 }
  0x26   :  { %v3049_v49 = vld [vmem:[#allocation4 + $0x3c0] sm:$0xf]  ;;  %v2922_v50 = vor.u32 %v3817_v48, %v2921_v47  ;;  %1003 = vmatpush.bf16.msrb.mxu0 %v2666_v37  ;;  %v3745_v55 = vld [vmem:[#allocation4 + $0x8c] sm:$0xf0]  ;;  %1016 = vmatpush.bf16.msrb.mxu1 %v2794_v42  ;;  %v3755_v47 = vld [vmem:[#allocation4 + $0xe4] sm:$0xf] }
  0x27   :  { %v3050_v53 = vor.u32 %v3849_v51, %v3049_v49  ;;  %v2633_v54 = vld [vmem:[#allocation4 + $0x80] sm:$0xf]  ;;  %v3813_v58 = vld [vmem:[#allocation4 + $0x2ac] sm:$0xf0]  ;;  %v2683_v48 = vld [vmem:[#allocation4 + $0xf0] sm:$0xf0] }
  0x28   :  { %v2905_v56 = vld [vmem:[#allocation4 + $0x2a0] sm:$0xf]  ;;  %v3845_v60 = vld [vmem:[#allocation4 + $0x3ac] sm:$0xf0]  ;;  %1029 = vmatpush.bf16.msrb.mxu2 %v2922_v50  ;;  %v2634_v0 = vor.u32 %v3745_v55, %v2633_v54  ;;  %v3787_v49 = vld [vmem:[#allocation4 + $0x1e4] sm:$0xf] }
  0x29   :  { %v3033_v59 = vld [vmem:[#allocation4 + $0x3a0] sm:$0xf]  ;;  %v3777_v62 = vld [vmem:[#allocation4 + $0x18c] sm:$0xf0]  ;;  %v2906_v63 = vor.u32 %v3813_v58, %v2905_v56  ;;  %1042 = vmatpush.bf16.msrb.mxu3 %v3050_v53  ;;  %v2811_v50 = vld [vmem:[#allocation4 + $0x1f0] sm:$0xf0] }
  0x2a   :  { %v2761_v61 = vld [vmem:[#allocation4 + $0x180] sm:$0xf]  ;;  %1004 = vmatpush.bf16.msrb.mxu0 %v2650_v52  ;;  %v3034_v1 = vor.u32 %v3845_v60, %v3033_v59  ;;  %v3809_v4 = vld [vmem:[#allocation4 + $0x28c] sm:$0xf0]  ;;  %1017 = vmatpush.bf16.msrb.mxu1 %v2778_v57  ;;  %v3751_v54 = vld [vmem:[#allocation4 + $0xc4] sm:$0xf]  ;;  %v2686_v59 = vor.u32 %v3755_v47, %v2683_v48 }
  0x2b   :  { %v2617_v2 = vld [vmem:[#allocation4 + $0x60] sm:$0xf]  ;;  %v2762_v5 = vor.u32 %v3777_v62, %v2761_v61  ;;  %v3741_v6 = vld [vmem:[#allocation4 + $0x6c] sm:$0xf0]  ;;  %v3819_v61 = vld [vmem:[#allocation4 + $0x2e4] sm:$0xf] }
  0x2c   :  { %v2889_v3 = vld [vmem:[#allocation4 + $0x280] sm:$0xf]  ;;  %v3841_v8 = vld [vmem:[#allocation4 + $0x38c] sm:$0xf0]  ;;  %1030 = vmatpush.bf16.msrb.mxu2 %v2906_v63  ;;  %v2618_v12 = vor.u32 %v3741_v6, %v2617_v2  ;;  %v2939_v62 = vld [vmem:[#allocation4 + $0x2f0] sm:$0xf0]  ;;  %v2814_v63 = vor.u32 %v3787_v49, %v2811_v50 }
  0x2d   :  { %v3017_v7 = vld [vmem:[#allocation4 + $0x380] sm:$0xf]  ;;  %v3773_v10 = vld [vmem:[#allocation4 + $0x16c] sm:$0xf0]  ;;  %v2890_v11 = vor.u32 %v3809_v4, %v2889_v3  ;;  %1043 = vmatpush.bf16.msrb.mxu3 %v3034_v1  ;;  %v3851_v1 = vld [vmem:[#allocation4 + $0x3e4] sm:$0xf] }
  0x2e   :  { %v2745_v9 = vld [vmem:[#allocation4 + $0x160] sm:$0xf]  ;;  %1005 = vmatpush.bf16.msrb.mxu0 %v2634_v0  ;;  %v3018_v13 = vor.u32 %v3841_v8, %v3017_v7  ;;  %v3805_v16 = vld [vmem:[#allocation4 + $0x26c] sm:$0xf0]  ;;  %1018 = vmatpush.bf16.msrb.mxu1 %v2762_v5  ;;  %v2667_v0 = vld [vmem:[#allocation4 + $0xd0] sm:$0xf0]  ;;  %v2942_v7 = vor.u32 %v3819_v61, %v2939_v62 }
  0x2f   :  { %v2601_v14 = vld [vmem:[#allocation4 + $0x40] sm:$0xf]  ;;  %v2746_v17 = vor.u32 %v3773_v10, %v2745_v9  ;;  %v3737_v18 = vld [vmem:[#allocation4 + $0x4c] sm:$0xf0]  ;;  %v3067_v2 = vld [vmem:[#allocation4 + $0x3f0] sm:$0xf0]  ;;  %v2670_v8 = vor.u32 %v3751_v54, %v2667_v0 }
  0x30   :  { %v2873_v15 = vld [vmem:[#allocation4 + $0x260] sm:$0xf]  ;;  %v3837_v20 = vld [vmem:[#allocation4 + $0x36c] sm:$0xf0]  ;;  %1031 = vmatpush.bf16.msrb.mxu2 %v2890_v11  ;;  %v2602_v24 = vor.u32 %v3737_v18, %v2601_v14  ;;  %v3783_v3 = vld [vmem:[#allocation4 + $0x1c4] sm:$0xf]  ;;  %v3070_v9 = vor.u32 %v3851_v1, %v3067_v2 }
  0x31   :  { %v3001_v19 = vld [vmem:[#allocation4 + $0x360] sm:$0xf]  ;;  %v3769_v22 = vld [vmem:[#allocation4 + $0x14c] sm:$0xf0]  ;;  %v2874_v23 = vor.u32 %v3805_v16, %v2873_v15  ;;  %1044 = vmatpush.bf16.msrb.mxu3 %v3018_v13  ;;  %v2795_v4 = vld [vmem:[#allocation4 + $0x1d0] sm:$0xf0] }
  0x32   :  { %v2729_v21 = vld [vmem:[#allocation4 + $0x140] sm:$0xf]  ;;  %1006 = vmatpush.bf16.msrb.mxu0 %v2618_v12  ;;  %v3002_v25 = vor.u32 %v3837_v20, %v3001_v19  ;;  %v3801_v28 = vld [vmem:[#allocation4 + $0x24c] sm:$0xf0]  ;;  %1019 = vmatpush.bf16.msrb.mxu1 %v2746_v17  ;;  %v3747_v10 = vld [vmem:[#allocation4 + $0xa4] sm:$0xf]  ;;  %v2798_v13 = vor.u32 %v3783_v3, %v2795_v4 }
  0x33   :  { %v2585_v26 = vld [vmem:[#allocation4 + $0x20] sm:$0xf]  ;;  %v2730_v29 = vor.u32 %v3769_v22, %v2729_v21  ;;  %v3733_v30 = vld [vmem:[#allocation4 + $0x2c] sm:$0xf0]  ;;  %v3815_v11 = vld [vmem:[#allocation4 + $0x2c4] sm:$0xf] }
  0x34   :  { %v2857_v27 = vld [vmem:[#allocation4 + $0x240] sm:$0xf]  ;;  %v3833_v32 = vld [vmem:[#allocation4 + $0x34c] sm:$0xf0]  ;;  %1032 = vmatpush.bf16.msrb.mxu2 %v2874_v23  ;;  %v2586_v37 = vor.u32 %v3733_v30, %v2585_v26  ;;  %v2923_v12 = vld [vmem:[#allocation4 + $0x2d0] sm:$0xf0] }
  0x35   :  { %v2985_v31 = vld [vmem:[#allocation4 + $0x340] sm:$0xf]  ;;  %v3765_v34 = vld [vmem:[#allocation4 + $0x12c] sm:$0xf0]  ;;  %v2858_v35 = vor.u32 %v3801_v28, %v2857_v27  ;;  %1045 = vmatpush.bf16.msrb.mxu3 %v3002_v25  ;;  %v2651_v14 = vld [vmem:[#allocation4 + $0xb0] sm:$0xf0]  ;;  %v2926_v19 = vor.u32 %v3815_v11, %v2923_v12 }
  0x36   :  { %v2713_v33 = vld [vmem:[#allocation4 + $0x120] sm:$0xf]  ;;  %1007 = vmatpush.bf16.msrb.mxu0 %v2602_v24  ;;  %v2986_v38 = vor.u32 %v3833_v32, %v2985_v31  ;;  %v3729_v39 = vld [vmem:[#allocation4 + $0xc] sm:$0xf0]  ;;  %1020 = vmatpush.bf16.msrb.mxu1 %v2730_v29  ;;  %v3847_v15 = vld [vmem:[#allocation4 + $0x3c4] sm:$0xf]  ;;  %v2654_v20 = vor.u32 %v3747_v10, %v2651_v14 }
  0x37   :  { %v2569_v36 = vld [vmem:[#allocation4] sm:$0xf]  ;;  %v3797_v41 = vld [vmem:[#allocation4 + $0x22c] sm:$0xf0]  ;;  %v2714_v42 = vor.u32 %v3765_v34, %v2713_v33  ;;  %v3051_v16 = vld [vmem:[#allocation4 + $0x3d0] sm:$0xf0] }
  0x38   :  { %v2841_v40 = vld [vmem:[#allocation4 + $0x220] sm:$0xf]  ;;  %v3829_v45 = vld [vmem:[#allocation4 + $0x32c] sm:$0xf0]  ;;  %1033 = vmatpush.bf16.msrb.mxu2 %v2858_v35  ;;  %v2570_v52 = vor.u32 %v3729_v39, %v2569_v36  ;;  %v3779_v17 = vld [vmem:[#allocation4 + $0x1a4] sm:$0xf]  ;;  %v3054_v21 = vor.u32 %v3847_v15, %v3051_v16 }
  0x39   :  { %v2697_v43 = vld [vmem:[#allocation4 + $0x100] sm:$0xf]  ;;  %v3761_v46 = vld [vmem:[#allocation4 + $0x10c] sm:$0xf0]  ;;  %v2842_v51 = vor.u32 %v3797_v41, %v2841_v40  ;;  %1046 = vmatpush.bf16.msrb.mxu3 %v2986_v38  ;;  %v2779_v18 = vld [vmem:[#allocation4 + $0x1b0] sm:$0xf0] }
  0x3a   :  { %v2969_v44 = vld [vmem:[#allocation4 + $0x320] sm:$0xf]  ;;  %1008 = vmatpush.bf16.msrb.mxu0 %v2586_v37  ;;  %v3793_v56 = vld [vmem:[#allocation4 + $0x20c] sm:$0xf0]  ;;  %1021 = vmatpush.bf16.msrb.mxu1 %v2714_v42  ;;  %v2698_v58 = vor.u32 %v3761_v46, %v2697_v43  ;;  %v3743_v22 = vld [vmem:[#allocation4 + $0x84] sm:$0xf]  ;;  %v2782_v25 = vor.u32 %v3779_v17, %v2779_v18 }
  0x3b   :  { %v2970_v53 = vor.u32 %v3829_v45, %v2969_v44  ;;  %v2825_v55 = vld [vmem:[#allocation4 + $0x200] sm:$0xf]  ;;  %v3825_v60 = vld [vmem:[#allocation4 + $0x30c] sm:$0xf0]  ;;  %v3811_v23 = vld [vmem:[#allocation4 + $0x2a4] sm:$0xf] }
  0x3c   :  { %v2953_v57 = vld [vmem:[#allocation4 + $0x300] sm:$0xf]  ;;  %1034 = vmatpush.bf16.msrb.mxu2 %v2842_v51  ;;  %v2826_v5 = vor.u32 %v3793_v56, %v2825_v55  ;;  %v2907_v24 = vld [vmem:[#allocation4 + $0x2b0] sm:$0xf0]  ;;  %v3843_v27 = vld [vmem:[#allocation4 + $0x3a4] sm:$0xf] }
  0x3d   :  { %1047 = vmatpush.bf16.msrb.mxu3 %v2970_v53  ;;  %v2954_v6 = vor.u32 %v3825_v60, %v2953_v57  ;;  %v2635_v26 = vld [vmem:[#allocation4 + $0x90] sm:$0xf0]  ;;  %v3775_v29 = vld [vmem:[#allocation4 + $0x184] sm:$0xf]  ;;  %v2910_v31 = vor.u32 %v3811_v23, %v2907_v24 }
  0x3e   :  { %1009 = vmatpush.bf16.msrb.mxu0 %v2570_v52  ;;  %1022 = vmatpush.bf16.msrb.mxu1 %v2698_v58  ;;  %v3035_v28 = vld [vmem:[#allocation4 + $0x3b0] sm:$0xf0]  ;;  %v2638_v32 = vor.u32 %v3743_v22, %v2635_v26  ;;  %v3739_v34 = vld [vmem:[#allocation4 + $0x64] sm:$0xf] }
  0x3f   :  { %v2763_v30 = vld [vmem:[#allocation4 + $0x190] sm:$0xf0]  ;;  %v3038_v33 = vor.u32 %v3843_v27, %v3035_v28  ;;  %v3807_v35 = vld [vmem:[#allocation4 + $0x284] sm:$0xf] }
  0x40   :  { %1035 = vmatpush.bf16.msrb.mxu2 %v2826_v5  ;;  %v2891_v36 = vld [vmem:[#allocation4 + $0x290] sm:$0xf0]  ;;  %v2766_v37 = vor.u32 %v3775_v29, %v2763_v30  ;;  %v3839_v39 = vld [vmem:[#allocation4 + $0x384] sm:$0xf] }
  0x41   :  { %1048 = vmatpush.bf16.msrb.mxu3 %v2954_v6  ;;  %v2619_v38 = vld [vmem:[#allocation4 + $0x70] sm:$0xf0]  ;;  %v3771_v41 = vld [vmem:[#allocation4 + $0x164] sm:$0xf]  ;;  %v2894_v43 = vor.u32 %v3807_v35, %v2891_v36  ;;  %v3790_v35 = vld [vmem:[#allocation4 + $0x1f4] sm:$0xf0] }
  0x42   :  { %1054 = vmatpush.bf16.msra.mxu0 %v2686_v59  ;;  %1067 = vmatpush.bf16.msra.mxu1 %v2814_v63  ;;  %v3019_v40 = vld [vmem:[#allocation4 + $0x390] sm:$0xf0]  ;;  %v2622_v44 = vor.u32 %v3739_v34, %v2619_v38  ;;  %v3735_v47 = vld [vmem:[#allocation4 + $0x44] sm:$0xf]  ;;  %v2817_v34 = vld [vmem:[#allocation4 + $0x1e8] sm:$0xf] }
  0x43   :  { %v2747_v42 = vld [vmem:[#allocation4 + $0x170] sm:$0xf0]  ;;  %v3022_v45 = vor.u32 %v3839_v39, %v3019_v40  ;;  %v3767_v49 = vld [vmem:[#allocation4 + $0x144] sm:$0xf] }
  0x44   :  { %1080 = vmatpush.bf16.msra.mxu2 %v2942_v7  ;;  %v2750_v46 = vor.u32 %v3771_v41, %v2747_v42  ;;  %v2603_v48 = vld [vmem:[#allocation4 + $0x50] sm:$0xf0]  ;;  %v3803_v53 = vld [vmem:[#allocation4 + $0x264] sm:$0xf]  ;;  %v2818_v42 = vor.u32 %v3790_v35, %v2817_v34 }
  0x45   :  { %1093 = vmatpush.bf16.msra.mxu3 %v3070_v9  ;;  %v2731_v50 = vld [vmem:[#allocation4 + $0x150] sm:$0xf0]  ;;  %v2606_v51 = vor.u32 %v3735_v47, %v2603_v48  ;;  %v3835_v55 = vld [vmem:[#allocation4 + $0x364] sm:$0xf]  ;;  %v3786_v47 = vld [vmem:[#allocation4 + $0x1d4] sm:$0xf0] }
  0x46   :  { %1055 = vmatpush.bf16.msra.mxu0 %v2670_v8  ;;  %1068 = vmatpush.bf16.msra.mxu1 %v2798_v13  ;;  %v2734_v52 = vor.u32 %v3767_v49, %v2731_v50  ;;  %v2875_v54 = vld [vmem:[#allocation4 + $0x270] sm:$0xf0]  ;;  %v3731_v59 = vld [vmem:[#allocation4 + $0x24] sm:$0xf] }
  0x47   :  { %v2878_v56 = vor.u32 %v3803_v53, %v2875_v54  ;;  %v3003_v57 = vld [vmem:[#allocation4 + $0x370] sm:$0xf0]  ;;  %v3763_v62 = vld [vmem:[#allocation4 + $0x124] sm:$0xf]  ;;  %v2945_v53 = vld [vmem:[#allocation4 + $0x2e8] sm:$0xf] }
  0x48   :  { %1081 = vmatpush.bf16.msra.mxu2 %v2926_v19  ;;  %v3006_v58 = vor.u32 %v3835_v55, %v3003_v57  ;;  %v2587_v60 = vld [vmem:[#allocation4 + $0x30] sm:$0xf0]  ;;  %v3799_v1 = vld [vmem:[#allocation4 + $0x244] sm:$0xf]  ;;  %v3822_v54 = vld [vmem:[#allocation4 + $0x2f4] sm:$0xf0] }
  0x49   :  { %1094 = vmatpush.bf16.msra.mxu3 %v3054_v21  ;;  %v2590_v61 = vor.u32 %v3731_v59, %v2587_v60  ;;  %v2715_v63 = vld [vmem:[#allocation4 + $0x130] sm:$0xf0]  ;;  %v3831_v3 = vld [vmem:[#allocation4 + $0x344] sm:$0xf]  ;;  %v3073_v55 = vld [vmem:[#allocation4 + $0x3e8] sm:$0xf] }
  0x4a   :  { %1056 = vmatpush.bf16.msra.mxu0 %v2654_v20  ;;  %1069 = vmatpush.bf16.msra.mxu1 %v2782_v25  ;;  %v2718_v0 = vor.u32 %v3763_v62, %v2715_v63  ;;  %v2859_v2 = vld [vmem:[#allocation4 + $0x250] sm:$0xf0]  ;;  %v3727_v7 = vld [vmem:[#allocation4 + $0x4] sm:$0xf]  ;;  %v3854_v59 = vld [vmem:[#allocation4 + $0x3f4] sm:$0xf0] }
  0x4b   :  { %v2862_v4 = vor.u32 %v3799_v1, %v2859_v2  ;;  %v2987_v5 = vld [vmem:[#allocation4 + $0x350] sm:$0xf0]  ;;  %v3759_v9 = vld [vmem:[#allocation4 + $0x104] sm:$0xf]  ;;  %v2657_v60 = vld [vmem:[#allocation4 + $0xa8] sm:$0xf]  ;;  %v2946_v2 = vor.u32 %v3822_v54, %v2945_v53 }
  0x4c   :  { %1082 = vmatpush.bf16.msra.mxu2 %v2910_v31  ;;  %v2990_v6 = vor.u32 %v3831_v3, %v2987_v5  ;;  %v2571_v8 = vld [vmem:[#allocation4 + $0x10] sm:$0xf0]  ;;  %v3795_v13 = vld [vmem:[#allocation4 + $0x224] sm:$0xf]  ;;  %v2689_v31 = vld [vmem:[#allocation4 + $0xe8] sm:$0xf] }
  0x4d   :  { %1095 = vmatpush.bf16.msra.mxu3 %v3038_v33  ;;  %v2574_v10 = vor.u32 %v3727_v7, %v2571_v8  ;;  %v2699_v11 = vld [vmem:[#allocation4 + $0x110] sm:$0xf0]  ;;  %v3827_v16 = vld [vmem:[#allocation4 + $0x324] sm:$0xf]  ;;  %v2785_v63 = vld [vmem:[#allocation4 + $0x1a8] sm:$0xf] }
  0x4e   :  { %1057 = vmatpush.bf16.msra.mxu0 %v2638_v32  ;;  %1070 = vmatpush.bf16.msra.mxu1 %v2766_v37  ;;  %v2702_v12 = vor.u32 %v3759_v9, %v2699_v11  ;;  %v2843_v14 = vld [vmem:[#allocation4 + $0x230] sm:$0xf0]  ;;  %v3791_v19 = vld [vmem:[#allocation4 + $0x204] sm:$0xf]  ;;  %v3758_v32 = vld [vmem:[#allocation4 + $0xf4] sm:$0xf0] }
  0x4f   :  { %v2846_v15 = vor.u32 %v3795_v13, %v2843_v14  ;;  %v2971_v17 = vld [vmem:[#allocation4 + $0x330] sm:$0xf0]  ;;  %v3823_v22 = vld [vmem:[#allocation4 + $0x304] sm:$0xf]  ;;  %v2690_v39 = vor.u32 %v3758_v32, %v2689_v31  ;;  %v3818_v7 = vld [vmem:[#allocation4 + $0x2d4] sm:$0xf0] }
  0x50   :  { %1083 = vmatpush.bf16.msra.mxu2 %v2894_v43  ;;  %v2974_v18 = vor.u32 %v3827_v16, %v2971_v17  ;;  %v2827_v20 = vld [vmem:[#allocation4 + $0x210] sm:$0xf0]  ;;  %v109_v25 = vld [vmem:[#allocation9] ss:$4 sm:$0xf] }
  0x51   :  { %1096 = vmatpush.bf16.msra.mxu3 %v3022_v45  ;;  %v2830_v21 = vor.u32 %v3791_v19, %v2827_v20  ;;  %v2955_v23 = vld [vmem:[#allocation4 + $0x310] sm:$0xf0]  ;;  %v111_v26 = vperm.slane %v109_v25, 0  ;;  %v112_v27 = vperm.slane %v109_v25, 1  ;;  %v113_v38 = vperm.slane %v109_v25, 2 }
  0x52   :  { %1058 = vmatpush.bf16.msra.mxu0 %v2622_v44  ;;  %1071 = vmatpush.bf16.msra.mxu1 %v2750_v46  ;;  %v2958_v24 = vor.u32 %v3823_v22, %v2955_v23  ;;  %v114_v41 = vperm.slane %v109_v25, 3  ;;  %v2673_v43 = vld [vmem:[#allocation4 + $0xc8] sm:$0xf]  ;;  %v3754_v44 = vld [vmem:[#allocation4 + $0xd4] sm:$0xf0] }
  0x53   :  { %v2801_v46 = vld [vmem:[#allocation4 + $0x1c8] sm:$0xf]  ;;  %v3850_v11 = vld [vmem:[#allocation4 + $0x3d4] sm:$0xf0] }
  0x54   :  { %1084 = vmatpush.bf16.msra.mxu2 %v2878_v56  ;;  %v3057_v8 = vld [vmem:[#allocation4 + $0x3c8] sm:$0xf]  ;;  %v3746_v13 = vld [vmem:[#allocation4 + $0x94] sm:$0xf0] }
  0x55   :  { %1097 = vmatpush.bf16.msra.mxu3 %v3006_v58  ;;  %v2802_v58 = vor.u32 %v3786_v47, %v2801_v46  ;;  %v2769_v14 = vld [vmem:[#allocation4 + $0x188] sm:$0xf]  ;;  %v3058_v19 = vor.u32 %v3850_v11, %v3057_v8  ;;  %v3814_v22 = vld [vmem:[#allocation4 + $0x2b4] sm:$0xf0]  ;;  %v3788_v8 = vld [vmem:[#allocation4 + $0x1ec] sm:$0xf] }
  0x56   :  { %1059 = vmatpush.bf16.msra.mxu0 %v2606_v51  ;;  %1072 = vmatpush.bf16.msra.mxu1 %v2734_v52  ;;  %v2674_v52 = vor.u32 %v3754_v44, %v2673_v43  ;;  %v3846_v25 = vld [vmem:[#allocation4 + $0x3b4] sm:$0xf0]  ;;  %v2897_v32 = vld [vmem:[#allocation4 + $0x288] sm:$0xf] }
  0x57   :  { %v2881_v46 = vld [vmem:[#allocation4 + $0x268] sm:$0xf]  ;;  %v3806_v47 = vld [vmem:[#allocation4 + $0x274] sm:$0xf0] }
  0x58   :  { %1085 = vmatpush.bf16.msra.mxu2 %v2862_v4  ;;  %v3074_v4 = vor.u32 %v3854_v59, %v3073_v55  ;;  %v3734_v53 = vld [vmem:[#allocation4 + $0x34] sm:$0xf0]  ;;  %v2721_v54 = vld [vmem:[#allocation4 + $0x128] sm:$0xf] }
  0x59   :  { %1098 = vmatpush.bf16.msra.mxu3 %v2990_v6  ;;  %v2929_v6 = vld [vmem:[#allocation4 + $0x2c8] sm:$0xf]  ;;  %v3766_v55 = vld [vmem:[#allocation4 + $0x134] sm:$0xf0] }
  0x5a   :  { %1060 = vmatpush.bf16.msra.mxu0 %v2590_v61  ;;  %1073 = vmatpush.bf16.msra.mxu1 %v2718_v0  ;;  %v3750_v61 = vld [vmem:[#allocation4 + $0xb4] sm:$0xf0]  ;;  %v2930_v17 = vor.u32 %v3818_v7, %v2929_v6  ;;  %v2691_v7 = vld [vmem:[#allocation4 + $0xf8] sm:$0xf0] }
  0x5b   :  { %v3782_v0 = vld [vmem:[#allocation4 + $0x1b4] sm:$0xf0]  ;;  %v2658_v5 = vor.u32 %v3750_v61, %v2657_v60  ;;  %v2993_v60 = vld [vmem:[#allocation4 + $0x348] sm:$0xf] }
  0x5c   :  { %1086 = vmatpush.bf16.msra.mxu2 %v2846_v15  ;;  %v3778_v15 = vld [vmem:[#allocation4 + $0x194] sm:$0xf0] }
  0x5d   :  { %1099 = vmatpush.bf16.msra.mxu3 %v2974_v18  ;;  %v2770_v23 = vor.u32 %v3778_v15, %v2769_v14  ;;  %v3802_v59 = vld [vmem:[#allocation4 + $0x254] sm:$0xf0] }
  0x5e   :  { %1061 = vmatpush.bf16.msra.mxu0 %v2574_v10  ;;  %1074 = vmatpush.bf16.msra.mxu1 %v2702_v12  ;;  %v2786_v10 = vor.u32 %v3782_v0, %v2785_v63  ;;  %v2641_v12 = vld [vmem:[#allocation4 + $0x88] sm:$0xf]  ;;  %v3834_v63 = vld [vmem:[#allocation4 + $0x354] sm:$0xf0] }
  0x5f   :  { %v2642_v20 = vor.u32 %v3746_v13, %v2641_v12  ;;  %v2577_v0 = vld [vmem:[#allocation4 + $0x8] sm:$0xf]  ;;  %v2994_v11 = vor.u32 %v3834_v63, %v2993_v60  ;;  %v3798_v13 = vld [vmem:[#allocation4 + $0x234] sm:$0xf0]  ;;  %v3043_v63 = vld [vmem:[#allocation4 + $0x3b8] sm:$0xf0] }
  0x60   :  { %1087 = vmatpush.bf16.msra.mxu2 %v2830_v21  ;;  %v2913_v21 = vld [vmem:[#allocation4 + $0x2a8] sm:$0xf] }
  0x61   :  { %1100 = vmatpush.bf16.msra.mxu3 %v2958_v24  ;;  %v3041_v24 = vld [vmem:[#allocation4 + $0x3a8] sm:$0xf] }
  0x62   :  { %v3042_v31 = vor.u32 %v3846_v25, %v3041_v24  ;;  %v2849_v12 = vld [vmem:[#allocation4 + $0x228] sm:$0xf]  ;;  %v2803_v24 = vld [vmem:[#allocation4 + $0x1d8] sm:$0xf0] }
  0x9e   :  { %v172_v28 = vpop.f32.mrf.mxu0  ;;  %v185_v30 = vpop.f32.mrf.mxu1 }
  0x9f   :  { %v173_v29 = vadd.f32 %v172_v28, %v111_v26  ;;  %v186_v33 = vadd.f32 %v185_v30, %v112_v27  ;;  %v2625_v26 = vld [vmem:[#allocation4 + $0x68] sm:$0xf]  ;;  %v3742_v27 = vld [vmem:[#allocation4 + $0x74] sm:$0xf0]  ;;  %v2914_v30 = vor.u32 %v3814_v22, %v2913_v21  ;;  %v2850_v21 = vor.u32 %v3798_v13, %v2849_v12  ;;  %v2675_v22 = vld [vmem:[#allocation4 + $0xd8] sm:$0xf0] }
  0xa0   :  { %v2753_v28 = vld [vmem:[#allocation4 + $0x168] sm:$0xf]  ;;  %v2626_v34 = vor.u32 %v3742_v27, %v2625_v26  ;;  %v3794_v27 = vld [vmem:[#allocation4 + $0x214] sm:$0xf0]  ;;  %v3840_v12 = vld [vmem:[#allocation4 + $0x38c] sm:$0xf] }
  0xa1   :  { %v215_v36 = vmax.f32 %v173_v29, 0.0  ;;  %v216_v37 = vmax.f32 %v186_v33, 0.0  ;;  %v3774_v29 = vld [vmem:[#allocation4 + $0x174] sm:$0xf0]  ;;  %v2833_v26 = vld [vmem:[#allocation4 + $0x208] sm:$0xf] }
  0xa2   :  { %v3810_v33 = vld [vmem:[#allocation4 + $0x294] sm:$0xf0]  ;;  %v2754_v35 = vor.u32 %v3774_v29, %v2753_v28  ;;  %v2961_v28 = vld [vmem:[#allocation4 + $0x308] sm:$0xf]  ;;  %v3027_v13 = vld [vmem:[#allocation4 + $0x398] sm:$0xf0] }
  0xa3   :  { %v4217_v40 = vpack.c.bf16 %v215_v36, %v215_v36  ;;  %v4219_v45 = vpack.c.bf16 %v216_v37, %v216_v37  ;;  %v3025_v36 = vld [vmem:[#allocation4 + $0x388] sm:$0xf]  ;;  %v3842_v37 = vld [vmem:[#allocation4 + $0x394] sm:$0xf0]  ;;  %v2898_v43 = vor.u32 %v3810_v33, %v2897_v32 }
  0xa4   :  { %v3026_v44 = vor.u32 %v3842_v37, %v3025_v36  ;;  %v3826_v29 = vld [vmem:[#allocation4 + $0x314] sm:$0xf0]  ;;  %v3748_v36 = vld [vmem:[#allocation4 + $0xac] sm:$0xf]  ;;  %v2834_v37 = vor.u32 %v3794_v27, %v2833_v26  ;;  %v2595_v27 = vld [vmem:[#allocation4 + $0x38] sm:$0xf0] }
  0xa5   :  { %1010 = vmatmul.bf16.vlgmr.msrb.gmra.mxu0 %v4217_v40  ;;  %1023 = vmatmul.bf16.vlgmr.msrb.gmra.mxu1 %v4219_v45  ;;  %v3732_v26 = vld [vmem:[#allocation4 + $0x2c] sm:$0xf] }
  0xa6   :  { %v198_v48 = vpop.f32.mrf.mxu2  ;;  %v211_v50 = vpop.f32.mrf.mxu3  ;;  %1106 = vmatpush.bf16.msrb.mxu0 %v2690_v39  ;;  %1119 = vmatpush.bf16.msrb.mxu1 %v2818_v42  ;;  %v3738_v39 = vld [vmem:[#allocation4 + $0x54] sm:$0xf0] }
  0xa7   :  { %v199_v49 = vadd.f32 %v198_v48, %v113_v38  ;;  %v174_v51 = vpop.f32.mrf.mxu0  ;;  %v212_v56 = vadd.f32 %v211_v50, %v114_v41  ;;  %v187_v57 = vpop.f32.mrf.mxu1  ;;  %v2609_v38 = vld [vmem:[#allocation4 + $0x48] sm:$0xf]  ;;  %v3770_v42 = vld [vmem:[#allocation4 + $0x154] sm:$0xf0] }
  0xa8   :  { %v2737_v41 = vld [vmem:[#allocation4 + $0x148] sm:$0xf]  ;;  %v2610_v48 = vor.u32 %v3738_v39, %v2609_v38  ;;  %v3838_v51 = vld [vmem:[#allocation4 + $0x374] sm:$0xf0]  ;;  %v2659_v38 = vld [vmem:[#allocation4 + $0xb8] sm:$0xf0] }
  0xa9   :  { %v217_v62 = vmax.f32 %v199_v49, 0.0  ;;  %v218_v1 = vmax.f32 %v212_v56, 0.0  ;;  %v2738_v49 = vor.u32 %v3770_v42, %v2737_v41  ;;  %v3009_v50 = vld [vmem:[#allocation4 + $0x368] sm:$0xf]  ;;  %v2882_v56 = vor.u32 %v3806_v47, %v2881_v46  ;;  %v3780_v39 = vld [vmem:[#allocation4 + $0x1ac] sm:$0xf] }
  0xaa   :  { %1107 = vmatpush.bf16.msrb.mxu0 %v2674_v52  ;;  %1120 = vmatpush.bf16.msrb.mxu1 %v2802_v58  ;;  %v2593_v52 = vld [vmem:[#allocation4 + $0x28] sm:$0xf]  ;;  %v3010_v57 = vor.u32 %v3838_v51, %v3009_v50  ;;  %v2787_v41 = vld [vmem:[#allocation4 + $0x1b8] sm:$0xf0]  ;;  %v2962_v42 = vor.u32 %v3826_v29, %v2961_v28  ;;  %v3816_v46 = vld [vmem:[#allocation4 + $0x2cc] sm:$0xf] }
  0xab   :  { %v4223_v3 = vpack.c.bf16 %v217_v62, %v217_v62  ;;  %v4225_v9 = vpack.c.bf16 %v218_v1, %v218_v1  ;;  %v2865_v58 = vld [vmem:[#allocation4 + $0x248] sm:$0xf]  ;;  %v2594_v61 = vor.u32 %v3734_v53, %v2593_v52  ;;  %v2722_v62 = vor.u32 %v3766_v55, %v2721_v54  ;;  %v3730_v1 = vld [vmem:[#allocation4 + $0x14] sm:$0xf0]  ;;  %v2931_v47 = vld [vmem:[#allocation4 + $0x2d8] sm:$0xf0] }
  0xac   :  { %v2866_v6 = vor.u32 %v3802_v59, %v2865_v58  ;;  %v2578_v14 = vor.u32 %v3730_v1, %v2577_v0  ;;  %v3848_v50 = vld [vmem:[#allocation4 + $0x3cc] sm:$0xf]  ;;  %v3059_v51 = vld [vmem:[#allocation4 + $0x3d8] sm:$0xf0] }
  0xad   :  { %1036 = vmatmul.bf16.vlgmr.msrb.gmra.mxu2 %v4223_v3  ;;  %1049 = vmatmul.bf16.vlgmr.msrb.gmra.mxu3 %v4225_v9  ;;  %v3744_v52 = vld [vmem:[#allocation4 + $0x8c] sm:$0xf]  ;;  %v2643_v53 = vld [vmem:[#allocation4 + $0x98] sm:$0xf0] }
  0xae   :  { %1132 = vmatpush.bf16.msrb.mxu2 %v2946_v2  ;;  %v200_v16 = vpop.f32.mrf.mxu2  ;;  %1145 = vmatpush.bf16.msrb.mxu3 %v3074_v4  ;;  %v213_v18 = vpop.f32.mrf.mxu3  ;;  %v2705_v2 = vld [vmem:[#allocation4 + $0x108] sm:$0xf]  ;;  %v3762_v4 = vld [vmem:[#allocation4 + $0x114] sm:$0xf0]  ;;  %v3776_v54 = vld [vmem:[#allocation4 + $0x18c] sm:$0xf]  ;;  %v2646_v60 = vor.u32 %v3744_v52, %v2643_v53 }
  0xaf   :  { %1108 = vmatpush.bf16.msrb.mxu0 %v2658_v5  ;;  %1121 = vmatpush.bf16.msrb.mxu1 %v2786_v10  ;;  %v3756_v5 = vld [vmem:[#allocation4 + $0xec] sm:$0xf]  ;;  %v2819_v10 = vld [vmem:[#allocation4 + $0x1f8] sm:$0xf0]  ;;  %v2706_v15 = vor.u32 %v3762_v4, %v2705_v2  ;;  %v2977_v16 = vld [vmem:[#allocation4 + $0x328] sm:$0xf] }
  0xb0   :  { %v2694_v18 = vor.u32 %v3756_v5, %v2691_v7  ;;  %v2771_v55 = vld [vmem:[#allocation4 + $0x198] sm:$0xf0]  ;;  %v3812_v58 = vld [vmem:[#allocation4 + $0x2ac] sm:$0xf] }
  0xb1   :  { %v2915_v59 = vld [vmem:[#allocation4 + $0x2b8] sm:$0xf0]  ;;  %v3740_v0 = vld [vmem:[#allocation4 + $0x6c] sm:$0xf] }
  0xb2   :  { %1133 = vmatpush.bf16.msrb.mxu2 %v2930_v17  ;;  %1146 = vmatpush.bf16.msrb.mxu3 %v3058_v19  ;;  %v3830_v17 = vld [vmem:[#allocation4 + $0x334] sm:$0xf0]  ;;  %v2822_v19 = vor.u32 %v3788_v8, %v2819_v10  ;;  %v2627_v1 = vld [vmem:[#allocation4 + $0x78] sm:$0xf0]  ;;  %v3772_v2 = vld [vmem:[#allocation4 + $0x16c] sm:$0xf]  ;;  %v2918_v5 = vor.u32 %v3812_v58, %v2915_v59 }
  0xb3   :  { %1109 = vmatpush.bf16.msrb.mxu0 %v2642_v20  ;;  %1122 = vmatpush.bf16.msrb.mxu1 %v2770_v23  ;;  %v3752_v20 = vld [vmem:[#allocation4 + $0xcc] sm:$0xf]  ;;  %v2978_v25 = vor.u32 %v3830_v17, %v2977_v16  ;;  %v2755_v4 = vld [vmem:[#allocation4 + $0x178] sm:$0xf0]  ;;  %v2630_v10 = vor.u32 %v3740_v0, %v2627_v1 }
  0xb4   :  { %v3784_v23 = vld [vmem:[#allocation4 + $0x1cc] sm:$0xf]  ;;  %v2678_v32 = vor.u32 %v3752_v20, %v2675_v22  ;;  %v2899_v8 = vld [vmem:[#allocation4 + $0x298] sm:$0xf0] }
  0xb5   :  { %1062 = vmatmul.bf16.vlgmr.msra.gmra.mxu0 %v4217_v40  ;;  %1075 = vmatmul.bf16.vlgmr.msra.gmra.mxu1 %v4219_v45  ;;  %v2806_v33 = vor.u32 %v3784_v23, %v2803_v24  ;;  %v3808_v7 = vld [vmem:[#allocation4 + $0x28c] sm:$0xf]  ;;  %v2739_v17 = vld [vmem:[#allocation4 + $0x158] sm:$0xf0] }
  0xb6   :  { %1134 = vmatpush.bf16.msrb.mxu2 %v2914_v30  ;;  %1147 = vmatpush.bf16.msrb.mxu3 %v3042_v31  ;;  %v3820_v30 = vld [vmem:[#allocation4 + $0x2ec] sm:$0xf]  ;;  %v2947_v31 = vld [vmem:[#allocation4 + $0x2f8] sm:$0xf0] }
  0xb7   :  { %1110 = vmatpush.bf16.msrb.mxu0 %v2626_v34  ;;  %1123 = vmatpush.bf16.msrb.mxu1 %v2754_v35  ;;  %v3852_v34 = vld [vmem:[#allocation4 + $0x3ec] sm:$0xf]  ;;  %v3075_v35 = vld [vmem:[#allocation4 + $0x3f8] sm:$0xf0] }
  0xb8   :  { %v3768_v16 = vld [vmem:[#allocation4 + $0x14c] sm:$0xf]  ;;  %v2723_v29 = vld [vmem:[#allocation4 + $0x138] sm:$0xf0] }
  0xb9   :  { %v3804_v20 = vld [vmem:[#allocation4 + $0x26c] sm:$0xf]  ;;  %v2742_v23 = vor.u32 %v3768_v16, %v2739_v17  ;;  %v2835_v1 = vld [vmem:[#allocation4 + $0x218] sm:$0xf0]  ;;  %v3433_v17 = vld [vmem:[#allocation6 + $0x2c0] sm:$0xf] }
  0xba   :  { %1135 = vmatpush.bf16.msrb.mxu2 %v2898_v43  ;;  %1148 = vmatpush.bf16.msrb.mxu3 %v3026_v44  ;;  %v2950_v43 = vor.u32 %v3820_v30, %v2947_v31  ;;  %v3078_v44 = vor.u32 %v3852_v34, %v3075_v35  ;;  %v3836_v24 = vld [vmem:[#allocation4 + $0x36c] sm:$0xf]  ;;  %v2598_v35 = vor.u32 %v3732_v26, %v2595_v27  ;;  %v3869_v26 = vld [vmem:[#allocation6 + $0x6c] sm:$0xf0] }
  0xbb   :  { %1111 = vmatpush.bf16.msrb.mxu0 %v2610_v48  ;;  %1124 = vmatpush.bf16.msrb.mxu1 %v2738_v49  ;;  %v2662_v48 = vor.u32 %v3748_v36, %v2659_v38  ;;  %v2790_v49 = vor.u32 %v3780_v39, %v2787_v41  ;;  %v3764_v28 = vld [vmem:[#allocation4 + $0x12c] sm:$0xf]  ;;  %v2579_v39 = vld [vmem:[#allocation4 + $0x18] sm:$0xf0] }
  0xbc   :  { %v3832_v34 = vld [vmem:[#allocation4 + $0x34c] sm:$0xf]  ;;  %v2726_v36 = vor.u32 %v3764_v28, %v2723_v29  ;;  %v3257_v28 = vld [vmem:[#allocation6 + $0x160] sm:$0xf]  ;;  %v3901_v29 = vld [vmem:[#allocation6 + $0x16c] sm:$0xf0] }
  0xbd   :  { %1088 = vmatmul.bf16.vlgmr.msra.gmra.mxu2 %v4223_v3  ;;  %1101 = vmatmul.bf16.vlgmr.msra.gmra.mxu3 %v4225_v9  ;;  %v3728_v38 = vld [vmem:[#allocation4 + $0xc] sm:$0xf] }
  0xbe   :  { %1136 = vmatpush.bf16.msrb.mxu2 %v2882_v56  ;;  %1149 = vmatpush.bf16.msrb.mxu3 %v3010_v57  ;;  %v2934_v56 = vor.u32 %v3816_v46, %v2931_v47  ;;  %v3062_v57 = vor.u32 %v3848_v50, %v3059_v51  ;;  %v3760_v41 = vld [vmem:[#allocation4 + $0x10c] sm:$0xf]  ;;  %v3885_v46 = vld [vmem:[#allocation6 + $0xec] sm:$0xf0]  ;;  %v3321_v47 = vld [vmem:[#allocation6 + $0x1e0] sm:$0xf]  ;;  %v2582_v52 = vor.u32 %v3728_v38, %v2579_v39 }
  0xbf   :  { %1112 = vmatpush.bf16.msrb.mxu0 %v2594_v61  ;;  %1125 = vmatpush.bf16.msrb.mxu1 %v2722_v62  ;;  %v2774_v61 = vor.u32 %v3776_v54, %v2771_v55  ;;  %v3844_v62 = vld [vmem:[#allocation4 + $0x3ac] sm:$0xf]  ;;  %v2851_v51 = vld [vmem:[#allocation4 + $0x238] sm:$0xf0]  ;;  %v3081_v39 = vld [vmem:[#allocation6] sm:$0xf] }
  0xc0   :  { %v3796_v50 = vld [vmem:[#allocation4 + $0x22c] sm:$0xf]  ;;  %v2979_v55 = vld [vmem:[#allocation4 + $0x338] sm:$0xf0] }
  0xc1   :  { %v3828_v54 = vld [vmem:[#allocation4 + $0x32c] sm:$0xf]  ;;  %v2854_v59 = vor.u32 %v3796_v50, %v2851_v51  ;;  %v3875_v50 = vld [vmem:[#allocation6 + $0xa4] sm:$0xf]  ;;  %v3163_v51 = vld [vmem:[#allocation6 + $0xb0] sm:$0xf0] }
  0xc2   :  { %1137 = vmatpush.bf16.msrb.mxu2 %v2866_v6  ;;  %1150 = vmatpush.bf16.msrb.mxu3 %v2994_v11  ;;  %v3046_v6 = vor.u32 %v3844_v62, %v3043_v63  ;;  %v2758_v11 = vor.u32 %v3772_v2, %v2755_v4  ;;  %v3913_v62 = vld [vmem:[#allocation6 + $0x1cc] sm:$0xf0]  ;;  %v2982_v63 = vor.u32 %v3828_v54, %v2979_v55  ;;  %v3792_v0 = vld [vmem:[#allocation4 + $0x20c] sm:$0xf]  ;;  %v2963_v4 = vld [vmem:[#allocation4 + $0x318] sm:$0xf0] }
  0xc3   :  { %1113 = vmatpush.bf16.msrb.mxu0 %v2578_v14  ;;  %1126 = vmatpush.bf16.msrb.mxu1 %v2706_v15  ;;  %v3736_v14 = vld [vmem:[#allocation4 + $0x4c] sm:$0xf]  ;;  %v2611_v15 = vld [vmem:[#allocation4 + $0x58] sm:$0xf0]  ;;  %v3893_v54 = vld [vmem:[#allocation6 + $0x12c] sm:$0xf0] }
  0xc4   :  { %v2614_v22 = vor.u32 %v3736_v14, %v2611_v15  ;;  %v3824_v2 = vld [vmem:[#allocation4 + $0x30c] sm:$0xf]  ;;  %v3289_v14 = vld [vmem:[#allocation6 + $0x1a0] sm:$0xf]  ;;  %v3909_v15 = vld [vmem:[#allocation6 + $0x1ac] sm:$0xf0] }
  0xc5   :  { %v3417_v55 = vld [vmem:[#allocation6 + $0x2a0] sm:$0xf] }
  0xc6   :  { %1138 = vmatpush.bf16.msrb.mxu2 %v2850_v21  ;;  %1151 = vmatpush.bf16.msrb.mxu3 %v2978_v25  ;;  %v2883_v21 = vld [vmem:[#allocation4 + $0x278] sm:$0xf0] }
  0xc7   :  { %1158 = vmatpush.bf16.msra.mxu0 %v2694_v18  ;;  %1171 = vmatpush.bf16.msra.mxu1 %v2822_v19  ;;  %v2902_v18 = vor.u32 %v3808_v7, %v2899_v8  ;;  %v3030_v19 = vor.u32 %v3840_v12, %v3027_v13  ;;  %v3011_v25 = vld [vmem:[#allocation4 + $0x378] sm:$0xf0]  ;;  %v2886_v30 = vor.u32 %v3804_v20, %v2883_v21  ;;  %v3877_v12 = vld [vmem:[#allocation6 + $0xac] sm:$0xf0]  ;;  %v3145_v20 = vld [vmem:[#allocation6 + $0x80] sm:$0xf] }
  0xc8   :  { %1114 = vmatmul.bf16.vlgmr.msrb.gmra.mxu0 %v4217_v40  ;;  %1127 = vmatmul.bf16.vlgmr.msrb.gmra.mxu1 %v4219_v45  ;;  %v3014_v31 = vor.u32 %v3836_v24, %v3011_v25  ;;  %v2966_v13 = vor.u32 %v3824_v2, %v2963_v4  ;;  %v3873_v21 = vld [vmem:[#allocation6 + $0x8c] sm:$0xf0] }
  0xc9   :  { %v3905_v24 = vld [vmem:[#allocation6 + $0x18c] sm:$0xf0]  ;;  %v3146_v25 = vor.u32 %v3873_v21, %v3145_v20  ;;  %v3369_v21 = vld [vmem:[#allocation6 + $0x240] sm:$0xf] }
  0xca   :  { %1139 = vmatpush.bf16.msrb.mxu2 %v2834_v37  ;;  %1152 = vmatpush.bf16.msrb.mxu3 %v2962_v42  ;;  %v2995_v37 = vld [vmem:[#allocation4 + $0x358] sm:$0xf0]  ;;  %v3937_v2 = vld [vmem:[#allocation6 + $0x28c] sm:$0xf0] }
  0xcb   :  { %1159 = vmatpush.bf16.msra.mxu0 %v2678_v32  ;;  %1172 = vmatpush.bf16.msra.mxu1 %v2806_v33  ;;  %v3800_v32 = vld [vmem:[#allocation4 + $0x24c] sm:$0xf]  ;;  %v2867_v33 = vld [vmem:[#allocation4 + $0x258] sm:$0xf0] }
  0xcc   :  { %v2707_v42 = vld [vmem:[#allocation4 + $0x118] sm:$0xf0] }
  0xcd   :  { %1140 = vmatmul.bf16.vlgmr.msrb.gmra.mxu2 %v4223_v3  ;;  %1153 = vmatmul.bf16.vlgmr.msrb.gmra.mxu3 %v4225_v9  ;;  %v2710_v53 = vor.u32 %v3760_v41, %v2707_v42  ;;  %v3857_v41 = vld [vmem:[#allocation6 + $0xc] sm:$0xf0]  ;;  %v3883_v42 = vld [vmem:[#allocation6 + $0xe4] sm:$0xf] }
  0xce   :  { %1184 = vmatpush.bf16.msra.mxu2 %v2950_v43  ;;  %1197 = vmatpush.bf16.msra.mxu3 %v3078_v44  ;;  %v3193_v43 = vld [vmem:[#allocation6 + $0xe0] sm:$0xf]  ;;  %v2870_v44 = vor.u32 %v3800_v32, %v2867_v33  ;;  %v3865_v32 = vld [vmem:[#allocation6 + $0x4c] sm:$0xf0]  ;;  %v3258_v33 = vor.u32 %v3901_v29, %v3257_v28 }
  0xcf   :  { %1160 = vmatpush.bf16.msra.mxu0 %v2662_v48  ;;  %1173 = vmatpush.bf16.msra.mxu1 %v2790_v49  ;;  %v3917_v48 = vld [vmem:[#allocation6 + $0x1ec] sm:$0xf0]  ;;  %v2998_v49 = vor.u32 %v3832_v34, %v2995_v37  ;;  %v3241_v34 = vld [vmem:[#allocation6 + $0x140] sm:$0xf] }
  0xd0   :  { %v3322_v58 = vor.u32 %v3917_v48, %v3321_v47  ;;  %v3861_v37 = vld [vmem:[#allocation6 + $0x2c] sm:$0xf0]  ;;  %v3879_v47 = vld [vmem:[#allocation6 + $0xc4] sm:$0xf]  ;;  %v3179_v48 = vld [vmem:[#allocation6 + $0xd0] sm:$0xf0] }
  0xd1   :  { %v3353_v28 = vld [vmem:[#allocation6 + $0x220] sm:$0xf]  ;;  %v3925_v29 = vld [vmem:[#allocation6 + $0x22c] sm:$0xf0] }
  0xd2   :  { %1185 = vmatpush.bf16.msra.mxu2 %v2934_v56  ;;  %1198 = vmatpush.bf16.msra.mxu3 %v3062_v57  ;;  %v3194_v56 = vor.u32 %v3885_v46, %v3193_v43  ;;  %v3177_v57 = vld [vmem:[#allocation6 + $0xc0] sm:$0xf]  ;;  %v3195_v43 = vld [vmem:[#allocation6 + $0xf0] sm:$0xf0] }
  0xd3   :  { %1161 = vmatpush.bf16.msra.mxu0 %v2646_v60  ;;  %1174 = vmatpush.bf16.msra.mxu1 %v2774_v61  ;;  %v3881_v60 = vld [vmem:[#allocation6 + $0xcc] sm:$0xf0]  ;;  %v3305_v61 = vld [vmem:[#allocation6 + $0x1c0] sm:$0xf]  ;;  %v3198_v46 = vor.u32 %v3883_v42, %v3195_v43  ;;  %v3259_v42 = vld [vmem:[#allocation6 + $0x170] sm:$0xf0] }
  0xd4   :  { %v3178_v7 = vor.u32 %v3881_v60, %v3177_v57  ;;  %v3306_v8 = vor.u32 %v3913_v62, %v3305_v61  ;;  %v3941_v57 = vld [vmem:[#allocation6 + $0x2ac] sm:$0xf0]  ;;  %v3209_v62 = vld [vmem:[#allocation6 + $0x100] sm:$0xf] }
  0xd5   :  { %v3418_v60 = vor.u32 %v3941_v57, %v3417_v55  ;;  %v4241_v57 = vld [vmem:[#allocation9 + $0x1] ss:$4 sm:$0xf] }
  0xd6   :  { %1186 = vmatpush.bf16.msra.mxu2 %v2918_v5  ;;  %1199 = vmatpush.bf16.msra.mxu3 %v3046_v6  ;;  %v3449_v5 = vld [vmem:[#allocation6 + $0x2e0] sm:$0xf]  ;;  %v3949_v6 = vld [vmem:[#allocation6 + $0x2ec] sm:$0xf0] }
  0xd7   :  { %1162 = vmatpush.bf16.msra.mxu0 %v2630_v10  ;;  %1175 = vmatpush.bf16.msra.mxu1 %v2758_v11  ;;  %v2838_v10 = vor.u32 %v3792_v0, %v2835_v1  ;;  %v3161_v11 = vld [vmem:[#allocation6 + $0xa0] sm:$0xf]  ;;  %v3450_v16 = vor.u32 %v3949_v6, %v3449_v5  ;;  %v3867_v5 = vld [vmem:[#allocation6 + $0x64] sm:$0xf]  ;;  %v3131_v6 = vld [vmem:[#allocation6 + $0x70] sm:$0xf0] }
  0xd8   :  { %v3401_v0 = vld [vmem:[#allocation6 + $0x280] sm:$0xf] }
  0xd9   :  { %v3402_v4 = vor.u32 %v3937_v2, %v3401_v0  ;;  %v3227_v0 = vld [vmem:[#allocation6 + $0x130] sm:$0xf0] }
  0xda   :  { %1187 = vmatpush.bf16.msra.mxu2 %v2902_v18  ;;  %1200 = vmatpush.bf16.msra.mxu3 %v3030_v19  ;;  %v3945_v18 = vld [vmem:[#allocation6 + $0x2cc] sm:$0xf0]  ;;  %v3162_v19 = vor.u32 %v3877_v12, %v3161_v11  ;;  %v3385_v11 = vld [vmem:[#allocation6 + $0x260] sm:$0xf] }
  0xdb   :  { %1163 = vmatpush.bf16.msra.mxu0 %v2614_v22  ;;  %1176 = vmatpush.bf16.msra.mxu1 %v2742_v23  ;;  %v3290_v22 = vor.u32 %v3909_v15, %v3289_v14  ;;  %v3273_v23 = vld [vmem:[#allocation6 + $0x180] sm:$0xf]  ;;  %v3933_v12 = vld [vmem:[#allocation6 + $0x26c] sm:$0xf0]  ;;  %v3863_v15 = vld [vmem:[#allocation6 + $0x44] sm:$0xf] }
  0xdc   :  { %v3274_v27 = vor.u32 %v3905_v24, %v3273_v23  ;;  %v3386_v14 = vor.u32 %v3933_v12, %v3385_v11  ;;  %v3859_v24 = vld [vmem:[#allocation6 + $0x24] sm:$0xf] }
  0xdd   :  { %v3887_v12 = vld [vmem:[#allocation6 + $0x104] sm:$0xf] }
  0xde   :  { %1188 = vmatpush.bf16.msra.mxu2 %v2886_v30  ;;  %1201 = vmatpush.bf16.msra.mxu3 %v3014_v31  ;;  %v3113_v31 = vld [vmem:[#allocation6 + $0x40] sm:$0xf] }
  0xdf   :  { %1164 = vmatpush.bf16.msra.mxu0 %v2598_v35  ;;  %1177 = vmatpush.bf16.msra.mxu1 %v2726_v36  ;;  %v3897_v35 = vld [vmem:[#allocation6 + $0x14c] sm:$0xf0]  ;;  %v3097_v36 = vld [vmem:[#allocation6 + $0x20] sm:$0xf] }
  0xe0   :  { %v3098_v38 = vor.u32 %v3861_v37, %v3097_v36  ;;  %v3337_v36 = vld [vmem:[#allocation6 + $0x200] sm:$0xf]  ;;  %v3921_v37 = vld [vmem:[#allocation6 + $0x20c] sm:$0xf0] }
  0xe2   :  { %1189 = vmatpush.bf16.msra.mxu2 %v2870_v44  ;;  %1202 = vmatpush.bf16.msra.mxu3 %v2998_v49  ;;  %v3082_v44 = vor.u32 %v3857_v41, %v3081_v39  ;;  %v3182_v49 = vor.u32 %v3879_v47, %v3179_v48  ;;  %v3981_v39 = vld [vmem:[#allocation6 + $0x3ec] sm:$0xf0]  ;;  %v3899_v41 = vld [vmem:[#allocation6 + $0x164] sm:$0xf]  ;;  %v3451_v47 = vld [vmem:[#allocation6 + $0x2f0] sm:$0xf0] }
  0xe3   :  { %1165 = vmatpush.bf16.msra.mxu0 %v2582_v52  ;;  %1178 = vmatpush.bf16.msra.mxu1 %v2710_v53  ;;  %v3166_v52 = vor.u32 %v3875_v50, %v3163_v51  ;;  %v3225_v53 = vld [vmem:[#allocation6 + $0x120] sm:$0xf]  ;;  %v3977_v50 = vld [vmem:[#allocation6 + $0x3cc] sm:$0xf0] }
  0xe6   :  { %1190 = vmatpush.bf16.msra.mxu2 %v2854_v59  ;;  %1203 = vmatpush.bf16.msra.mxu3 %v2982_v63  ;;  %v3147_v59 = vld [vmem:[#allocation6 + $0x90] sm:$0xf0]  ;;  %v3889_v63 = vld [vmem:[#allocation6 + $0x10c] sm:$0xf0] }
  0xe7   :  { %1997 = vmatpush.bf16.msrb.mxu0 %v3194_v56  ;;  %2010 = vmatpush.bf16.msrb.mxu1 %v3322_v58  ;;  %v3226_v56 = vor.u32 %v3893_v54, %v3225_v53  ;;  %v3871_v58 = vld [vmem:[#allocation6 + $0x84] sm:$0xf]  ;;  %v3210_v1 = vor.u32 %v3889_v63, %v3209_v62  ;;  %v3243_v53 = vld [vmem:[#allocation6 + $0x150] sm:$0xf0] }
  0xe8   :  { %1166 = vmatmul.bf16.vlgmr.msra.gmra.mxu0 %v4217_v40  ;;  %1179 = vmatmul.bf16.vlgmr.msra.gmra.mxu1 %v4219_v45  ;;  %v3434_v40 = vor.u32 %v3945_v18, %v3433_v17  ;;  %v3129_v45 = vld [vmem:[#allocation6 + $0x60] sm:$0xf]  ;;  %v3150_v61 = vor.u32 %v3871_v58, %v3147_v59  ;;  %v3911_v17 = vld [vmem:[#allocation6 + $0x1c4] sm:$0xf] }
  0xe9   :  { %v3130_v30 = vor.u32 %v3869_v26, %v3129_v45  ;;  %v3291_v26 = vld [vmem:[#allocation6 + $0x1b0] sm:$0xf0]  ;;  %v3943_v54 = vld [vmem:[#allocation6 + $0x2c4] sm:$0xf]  ;;  %v3545_v59 = vld [vmem:[#allocation6 + $0x3a0] sm:$0xf] }
  0xea   :  { %1191 = vmatpush.bf16.msra.mxu2 %v2838_v10  ;;  %1204 = vmatpush.bf16.msra.mxu3 %v2966_v13  ;;  %v3323_v10 = vld [vmem:[#allocation6 + $0x1f0] sm:$0xf0]  ;;  %v3891_v63 = vld [vmem:[#allocation6 + $0x124] sm:$0xf] }
  0xeb   :  { %1998 = vmatpush.bf16.msrb.mxu0 %v3178_v7  ;;  %2011 = vmatpush.bf16.msrb.mxu1 %v3306_v8  ;;  %v3915_v7 = vld [vmem:[#allocation6 + $0x1e4] sm:$0xf]  ;;  %v3134_v8 = vor.u32 %v3867_v5, %v3131_v6  ;;  %v3419_v5 = vld [vmem:[#allocation6 + $0x2b0] sm:$0xf0]  ;;  %v354_v6 = vperm.slane %v4241_v57, 0 }
  0xec   :  { %v3326_v13 = vor.u32 %v3915_v7, %v3323_v10  ;;  %v3969_v10 = vld [vmem:[#allocation6 + $0x38c] sm:$0xf0] }
  0xed   :  { %1192 = vmatmul.bf16.vlgmr.msra.gmra.mxu2 %v4223_v3  ;;  %1205 = vmatmul.bf16.vlgmr.msra.gmra.mxu3 %v4225_v9  ;;  %v3114_v3 = vor.u32 %v3865_v32, %v3113_v31  ;;  %v3242_v9 = vor.u32 %v3897_v35, %v3241_v34  ;;  %v3855_v31 = vld [vmem:[#allocation6 + $0x4] sm:$0xf]  ;;  %v3083_v32 = vld [vmem:[#allocation6 + $0x10] sm:$0xf0] }
  0xee   :  { %2023 = vmatpush.bf16.msrb.mxu2 %v3450_v16  ;;  %v3115_v16 = vld [vmem:[#allocation6 + $0x50] sm:$0xf0]  ;;  %v3086_v34 = vor.u32 %v3855_v31, %v3083_v32 }
  0xef   :  { %1999 = vmatpush.bf16.msrb.mxu0 %v3162_v19  ;;  %2012 = vmatpush.bf16.msrb.mxu1 %v3290_v22  ;;  %v3118_v18 = vor.u32 %v3863_v15, %v3115_v16  ;;  %v3307_v19 = vld [vmem:[#allocation6 + $0x1d0] sm:$0xf0]  ;;  %v3929_v22 = vld [vmem:[#allocation6 + $0x24c] sm:$0xf0] }
  0xf0   :  { %v3310_v20 = vor.u32 %v3911_v17, %v3307_v19  ;;  %v3370_v23 = vor.u32 %v3929_v22, %v3369_v21  ;;  %v3275_v35 = vld [vmem:[#allocation6 + $0x190] sm:$0xf0]  ;;  %v3513_v19 = vld [vmem:[#allocation6 + $0x360] sm:$0xf] }
  0xf1   :  { %v3403_v16 = vld [vmem:[#allocation6 + $0x290] sm:$0xf0] }
  0xf2   :  { %2024 = vmatpush.bf16.msrb.mxu2 %v3434_v40  ;;  %v3099_v40 = vld [vmem:[#allocation6 + $0x30] sm:$0xf0] }
  0xf3   :  { %2000 = vmatpush.bf16.msrb.mxu0 %v3146_v25  ;;  %2013 = vmatpush.bf16.msrb.mxu1 %v3274_v27  ;;  %v3907_v25 = vld [vmem:[#allocation6 + $0x1a4] sm:$0xf]  ;;  %v3102_v45 = vor.u32 %v3859_v24, %v3099_v40  ;;  %v3387_v24 = vld [vmem:[#allocation6 + $0x270] sm:$0xf0] }
  0xf4   :  { %v3294_v27 = vor.u32 %v3907_v25, %v3291_v26  ;;  %v3497_v26 = vld [vmem:[#allocation6 + $0x340] sm:$0xf] }
  0xf6   :  { %2025 = vmatpush.bf16.msrb.mxu2 %v3418_v60  ;;  %v3973_v60 = vld [vmem:[#allocation6 + $0x3ac] sm:$0xf0] }
  0xf7   :  { %2001 = vmatpush.bf16.msrb.mxu0 %v3130_v30  ;;  %2014 = vmatpush.bf16.msrb.mxu1 %v3258_v33  ;;  %v3354_v30 = vor.u32 %v3925_v29, %v3353_v28  ;;  %v3903_v33 = vld [vmem:[#allocation6 + $0x184] sm:$0xf]  ;;  %v3546_v62 = vor.u32 %v3973_v60, %v3545_v59 }
  0xf8   :  { %v3927_v29 = vld [vmem:[#allocation6 + $0x244] sm:$0xf] }
  0xfa   :  { %2026 = vmatpush.bf16.msrb.mxu2 %v3402_v4  ;;  %v3230_v4 = vor.u32 %v3891_v63, %v3227_v0 }
  0xfb   :  { %2002 = vmatpush.bf16.msrb.mxu0 %v3114_v3  ;;  %2015 = vmatpush.bf16.msrb.mxu1 %v3242_v9  ;;  %v3278_v3 = vor.u32 %v3903_v33, %v3275_v35  ;;  %v3577_v9 = vld [vmem:[#allocation6 + $0x3e0] sm:$0xf]  ;;  %v3201_v35 = vld [vmem:[#allocation6 + $0xe8] sm:$0xf] }
  0xfc   :  { %v3578_v43 = vor.u32 %v3981_v39, %v3577_v9 }
  0xfe   :  { %2027 = vmatpush.bf16.msrb.mxu2 %v3386_v14  ;;  %2036 = vmatpush.bf16.msrb.mxu3 %v3578_v43  ;;  %v3935_v14 = vld [vmem:[#allocation6 + $0x284] sm:$0xf] }
  0xff   :  { %2003 = vmatpush.bf16.msrb.mxu0 %v3098_v38  ;;  %2016 = vmatpush.bf16.msrb.mxu1 %v3226_v56  ;;  %v3338_v38 = vor.u32 %v3921_v37, %v3337_v36  ;;  %v3435_v56 = vld [vmem:[#allocation6 + $0x2d0] sm:$0xf0]  ;;  %v3957_v36 = vld [vmem:[#allocation6 + $0x32c] sm:$0xf0] }
 0x100   :  { %v3438_v58 = vor.u32 %v3943_v54, %v3435_v56  ;;  %v3339_v56 = vld [vmem:[#allocation6 + $0x210] sm:$0xf0] }
 0x102   :  { %2028 = vmatpush.bf16.msrb.mxu2 %v3370_v23  ;;  %v3931_v23 = vld [vmem:[#allocation6 + $0x264] sm:$0xf] }
 0x103   :  { %2004 = vmatpush.bf16.msrb.mxu0 %v3082_v44  ;;  %2017 = vmatpush.bf16.msrb.mxu1 %v3210_v1  ;;  %v3262_v44 = vor.u32 %v3899_v41, %v3259_v42  ;;  %v3939_v1 = vld [vmem:[#allocation6 + $0x2a4] sm:$0xf]  ;;  %v3390_v25 = vor.u32 %v3931_v23, %v3387_v24  ;;  %v3355_v42 = vld [vmem:[#allocation6 + $0x230] sm:$0xf0]  ;;  %v3870_v23 = vld [vmem:[#allocation6 + $0x74] sm:$0xf0] }
 0x104   :  { %v3422_v7 = vor.u32 %v3939_v1, %v3419_v5  ;;  %v3923_v41 = vld [vmem:[#allocation6 + $0x224] sm:$0xf]  ;;  %v3169_v1 = vld [vmem:[#allocation6 + $0xa8] sm:$0xf]  ;;  %v3878_v5 = vld [vmem:[#allocation6 + $0xb4] sm:$0xf0] }
 0x105   :  { %v3329_v24 = vld [vmem:[#allocation6 + $0x1e8] sm:$0xf] }
 0x106   :  { %2029 = vmatpush.bf16.msrb.mxu2 %v3354_v30  ;;  %v3371_v30 = vld [vmem:[#allocation6 + $0x250] sm:$0xf0] }
 0x107   :  { %2049 = vmatpush.bf16.msra.mxu0 %v3198_v46  ;;  %2062 = vmatpush.bf16.msra.mxu1 %v3326_v13  ;;  %v3947_v46 = vld [vmem:[#allocation6 + $0x2e4] sm:$0xf]  ;;  %v3211_v13 = vld [vmem:[#allocation6 + $0x110] sm:$0xf0]  ;;  %v3374_v32 = vor.u32 %v3927_v29, %v3371_v30 }
 0x108   :  { %v3454_v48 = vor.u32 %v3947_v46, %v3451_v47  ;;  %v3214_v15 = vor.u32 %v3887_v12, %v3211_v13  ;;  %v355_v47 = vperm.slane %v4241_v57, 1  ;;  %v3153_v12 = vld [vmem:[#allocation6 + $0x88] sm:$0xf] }
 0x10a   :  { %2030 = vmatpush.bf16.msrb.mxu2 %v3338_v38  ;;  %v3886_v38 = vld [vmem:[#allocation6 + $0xf4] sm:$0xf0] }
 0x10b   :  { %2050 = vmatpush.bf16.msra.mxu0 %v3182_v49  ;;  %2063 = vmatpush.bf16.msra.mxu1 %v3310_v20  ;;  %v3561_v49 = vld [vmem:[#allocation6 + $0x3c0] sm:$0xf]  ;;  %v3965_v20 = vld [vmem:[#allocation6 + $0x36c] sm:$0xf0] }
 0x10c   :  { %v3562_v51 = vor.u32 %v3977_v50, %v3561_v49  ;;  %v3514_v22 = vor.u32 %v3965_v20, %v3513_v19  ;;  %v3202_v49 = vor.u32 %v3886_v38, %v3201_v35  ;;  %v3882_v50 = vld [vmem:[#allocation6 + $0xd4] sm:$0xf0]  ;;  %v3313_v35 = vld [vmem:[#allocation6 + $0x1c8] sm:$0xf]  ;;  %v356_v38 = vperm.slane %v4241_v57, 2 }
 0x10e   :  { %2075 = vmatpush.bf16.msra.mxu2 %v3454_v48  ;;  %2037 = vmatpush.bf16.msrb.mxu3 %v3562_v51  ;;  %v3185_v48 = vld [vmem:[#allocation6 + $0xc8] sm:$0xf]  ;;  %v3465_v51 = vld [vmem:[#allocation6 + $0x300] sm:$0xf] }
 0x10f   :  { %2051 = vmatpush.bf16.msra.mxu0 %v3166_v52  ;;  %2064 = vmatpush.bf16.msra.mxu1 %v3294_v27  ;;  %v3895_v52 = vld [vmem:[#allocation6 + $0x144] sm:$0xf]  ;;  %v3961_v27 = vld [vmem:[#allocation6 + $0x34c] sm:$0xf0]  ;;  %v3186_v0 = vor.u32 %v3882_v50, %v3185_v48  ;;  %v3297_v48 = vld [vmem:[#allocation6 + $0x1a8] sm:$0xf] }
 0x110   :  { %v3246_v55 = vor.u32 %v3895_v52, %v3243_v53  ;;  %v3498_v28 = vor.u32 %v3961_v27, %v3497_v26  ;;  %v3953_v52 = vld [vmem:[#allocation6 + $0x30c] sm:$0xf0]  ;;  %v3531_v26 = vld [vmem:[#allocation6 + $0x390] sm:$0xf0]  ;;  %v3959_v50 = vld [vmem:[#allocation6 + $0x344] sm:$0xf] }
 0x111   :  { %v3466_v54 = vor.u32 %v3953_v52, %v3465_v51  ;;  %v3499_v51 = vld [vmem:[#allocation6 + $0x350] sm:$0xf0] }
 0x112   :  { %2076 = vmatpush.bf16.msra.mxu2 %v3438_v58  ;;  %2038 = vmatpush.bf16.msrb.mxu3 %v3546_v62  ;;  %v3979_v58 = vld [vmem:[#allocation6 + $0x3e4] sm:$0xf] }
 0x113   :  { %2052 = vmatpush.bf16.msra.mxu0 %v3150_v61  ;;  %2065 = vmatpush.bf16.msra.mxu1 %v3278_v3  ;;  %v3481_v3 = vld [vmem:[#allocation6 + $0x320] sm:$0xf] }
 0x114   :  { %v3482_v39 = vor.u32 %v3957_v36, %v3481_v3  ;;  %v3914_v36 = vld [vmem:[#allocation6 + $0x1d4] sm:$0xf0] }
 0x116   :  { %2077 = vmatpush.bf16.msra.mxu2 %v3422_v7  ;;  %v3563_v7 = vld [vmem:[#allocation6 + $0x3d0] sm:$0xf0] }
 0x117   :  { %2053 = vmatpush.bf16.msra.mxu0 %v3134_v8  ;;  %2066 = vmatpush.bf16.msra.mxu1 %v3262_v44  ;;  %v3529_v8 = vld [vmem:[#allocation6 + $0x380] sm:$0xf]  ;;  %v3358_v44 = vor.u32 %v3923_v41, %v3355_v42 }
 0x118   :  { %v3530_v11 = vor.u32 %v3969_v10, %v3529_v8 }
 0x11a   :  { %2039 = vmatpush.bf16.msrb.mxu3 %v3530_v11  ;;  %v3170_v11 = vor.u32 %v3878_v5, %v3169_v1  ;;  %v3483_v1 = vld [vmem:[#allocation6 + $0x330] sm:$0xf0]  ;;  %v3203_v5 = vld [vmem:[#allocation6 + $0xf8] sm:$0xf0] }
 0x11b   :  { %2054 = vmatpush.bf16.msra.mxu0 %v3118_v18  ;;  %2067 = vmatpush.bf16.msra.mxu1 %v3246_v55  ;;  %v3406_v18 = vor.u32 %v3935_v14, %v3403_v16  ;;  %v3919_v55 = vld [vmem:[#allocation6 + $0x204] sm:$0xf]  ;;  %v3874_v14 = vld [vmem:[#allocation6 + $0x94] sm:$0xf0]  ;;  %v3547_v16 = vld [vmem:[#allocation6 + $0x3b0] sm:$0xf0] }
 0x11c   :  { %v3342_v60 = vor.u32 %v3919_v55, %v3339_v56  ;;  %v3502_v55 = vor.u32 %v3959_v50, %v3499_v51  ;;  %v3409_v50 = vld [vmem:[#allocation6 + $0x288] sm:$0xf]  ;;  %v3938_v51 = vld [vmem:[#allocation6 + $0x294] sm:$0xf0] }
 0x11d   :  { %2078 = vmatpush.bf16.msra.mxu2 %v3406_v18 }
 0x11e   :  { %2040 = vmatpush.bf16.msrb.mxu3 %v3514_v22  ;;  %v3137_v22 = vld [vmem:[#allocation6 + $0x68] sm:$0xf] }
 0x11f   :  { %2055 = vmatpush.bf16.msra.mxu0 %v3102_v45  ;;  %2068 = vmatpush.bf16.msra.mxu1 %v3230_v4 }
 0x121   :  { %2079 = vmatpush.bf16.msra.mxu2 %v3390_v25  ;;  %v3918_v25 = vld [vmem:[#allocation6 + $0x1f4] sm:$0xf0] }
 0x122   :  { %v1011_v61 = vpop.f32.mrf.mxu0  ;;  %v1024_v2 = vpop.f32.mrf.mxu1  ;;  %2041 = vmatpush.bf16.msrb.mxu3 %v3498_v28 }
 0x123   :  { %2056 = vmatpush.bf16.msra.mxu0 %v3086_v34  ;;  %v1012_v17 = vadd.f32 %v1011_v61, %v354_v6  ;;  %2069 = vmatpush.bf16.msra.mxu1 %v3214_v15  ;;  %v3579_v61 = vld [vmem:[#allocation6 + $0x3f0] sm:$0xf0]  ;;  %v3975_v6 = vld [vmem:[#allocation6 + $0x3c4] sm:$0xf] }
 0x124   :  { %v3582_v63 = vor.u32 %v3979_v58, %v3579_v61  ;;  %v3566_v10 = vor.u32 %v3975_v6, %v3563_v7  ;;  %v3971_v15 = vld [vmem:[#allocation6 + $0x3a4] sm:$0xf]  ;;  %v3858_v61 = vld [vmem:[#allocation6 + $0x14] sm:$0xf0] }
 0x125   :  { %v1025_v45 = vadd.f32 %v1024_v2, %v1012_v17  ;;  %2080 = vmatpush.bf16.msra.mxu2 %v3374_v32  ;;  %v3550_v18 = vor.u32 %v3971_v15, %v3547_v16  ;;  %v3330_v32 = vor.u32 %v3918_v25, %v3329_v24  ;;  %v3457_v16 = vld [vmem:[#allocation6 + $0x2e8] sm:$0xf] }
 0x126   :  { %2042 = vmatpush.bf16.msrb.mxu3 %v3482_v39 }
 0x129   :  { %2081 = vmatpush.bf16.msra.mxu2 %v3358_v44  ;;  %v3314_v44 = vor.u32 %v3914_v36, %v3313_v35 }
 0x12a   :  { %v1013_v21 = vpop.f32.mrf.mxu0  ;;  %v1026_v40 = vpop.f32.mrf.mxu1  ;;  %2043 = vmatpush.bf16.msrb.mxu3 %v3466_v54 }
 0x12b   :  { %v3154_v21 = vor.u32 %v3874_v14, %v3153_v12  ;;  %v3902_v14 = vld [vmem:[#allocation6 + $0x174] sm:$0xf0] }
 0x12d   :  { %2082 = vmatpush.bf16.msra.mxu2 %v3342_v60  ;;  %v3089_v60 = vld [vmem:[#allocation6 + $0x8] sm:$0xf] }
 0x12e   :  { %2088 = vmatpush.bf16.msra.mxu3 %v3582_v63  ;;  %v3906_v63 = vld [vmem:[#allocation6 + $0x194] sm:$0xf0] }
 0x130   :  { %v1037_v31 = vpop.f32.mrf.mxu2  ;;  %v1050_v34 = vpop.f32.mrf.mxu3 }
 0x131   :  { %v1038_v33 = vadd.f32 %v1037_v31, %v1025_v45  ;;  %v3967_v45 = vld [vmem:[#allocation6 + $0x384] sm:$0xf]  ;;  %v3138_v31 = vor.u32 %v3870_v23, %v3137_v22  ;;  %v3187_v22 = vld [vmem:[#allocation6 + $0xd8] sm:$0xf0] }
 0x132   :  { %v1063_v9 = vpop.f32.mrf.mxu0  ;;  %v1076_v43 = vpop.f32.mrf.mxu1  ;;  %2089 = vmatpush.bf16.msra.mxu3 %v3566_v10  ;;  %v3534_v28 = vor.u32 %v3967_v45, %v3531_v26  ;;  %v3249_v26 = vld [vmem:[#allocation6 + $0x148] sm:$0xf] }
 0x133   :  { %v1051_v37 = vadd.f32 %v1050_v34, %v1038_v33  ;;  %v1064_v2 = vadd.f32 %v1063_v9, %v355_v47  ;;  %v3121_v33 = vld [vmem:[#allocation6 + $0x48] sm:$0xf]  ;;  %v3866_v34 = vld [vmem:[#allocation6 + $0x54] sm:$0xf0]  ;;  %v3515_v9 = vld [vmem:[#allocation6 + $0x370] sm:$0xf0] }
 0x134   :  { %v3862_v47 = vld [vmem:[#allocation6 + $0x34] sm:$0xf0] }
 0x135   :  { %v1210_v46 = vmax.f32 %v1051_v37, 0.0  ;;  %v1077_v13 = vadd.f32 %v1076_v43, %v1064_v2  ;;  %v3963_v37 = vld [vmem:[#allocation6 + $0x364] sm:$0xf]  ;;  %v3122_v43 = vor.u32 %v3866_v34, %v3121_v33 }
 0x136   :  { %2090 = vmatpush.bf16.msra.mxu3 %v3550_v18  ;;  %v3518_v41 = vor.u32 %v3963_v37, %v3515_v9  ;;  %v3467_v18 = vld [vmem:[#allocation6 + $0x310] sm:$0xf0]  ;;  %v3233_v9 = vld [vmem:[#allocation6 + $0x128] sm:$0xf] }
 0x137   :  { %v4245_v53 = vpack.c.bf16 %v1210_v46, %v1210_v46  ;;  %v3105_v46 = vld [vmem:[#allocation6 + $0x28] sm:$0xf] }
 0x138   :  { %v1039_v59 = vpop.f32.mrf.mxu2  ;;  %v1052_v62 = vpop.f32.mrf.mxu3  ;;  %v3106_v58 = vor.u32 %v3862_v47, %v3105_v46 }
 0x139   :  { %2005 = vmatmul.bf16.vlgmr.msrb.gmra.mxu0 %v4245_v53  ;;  %v3281_v62 = vld [vmem:[#allocation6 + $0x188] sm:$0xf] }
 0x13a   :  { %2101 = vmatpush.bf16.msrb.mxu0 %v3202_v49  ;;  %v1065_v4 = vpop.f32.mrf.mxu0  ;;  %v1078_v8 = vpop.f32.mrf.mxu1  ;;  %2091 = vmatpush.bf16.msra.mxu3 %v3534_v28  ;;  %v3910_v49 = vld [vmem:[#allocation6 + $0x1b4] sm:$0xf0]  ;;  %v3282_v12 = vor.u32 %v3906_v63, %v3281_v62  ;;  %v3441_v28 = vld [vmem:[#allocation6 + $0x2c8] sm:$0xf]  ;;  %v3410_v62 = vor.u32 %v3938_v51, %v3409_v50 }
 0x13b   :  { %v3298_v59 = vor.u32 %v3910_v49, %v3297_v48  ;;  %v3884_v4 = vld [vmem:[#allocation6 + $0xec] sm:$0xf]  ;;  %v3217_v48 = vld [vmem:[#allocation6 + $0x108] sm:$0xf]  ;;  %v3890_v49 = vld [vmem:[#allocation6 + $0x114] sm:$0xf0] }
 0x13c   :  { %v3206_v15 = vor.u32 %v3884_v4, %v3203_v5  ;;  %v3864_v4 = vld [vmem:[#allocation6 + $0x4c] sm:$0xf]  ;;  %v3123_v5 = vld [vmem:[#allocation6 + $0x58] sm:$0xf0]  ;;  %v3569_v51 = vld [vmem:[#allocation6 + $0x3c8] sm:$0xf] }
 0x13e   :  { %2102 = vmatpush.bf16.msrb.mxu0 %v3186_v0  ;;  %2092 = vmatpush.bf16.msra.mxu3 %v3518_v41  ;;  %v3955_v0 = vld [vmem:[#allocation6 + $0x324] sm:$0xf]  ;;  %v3942_v41 = vld [vmem:[#allocation6 + $0x2b4] sm:$0xf0] }
 0x13f   :  { %v3486_v6 = vor.u32 %v3955_v0, %v3483_v1  ;;  %v3393_v0 = vld [vmem:[#allocation6 + $0x268] sm:$0xf] }
 0x140   :  { %v1089_v17 = vpop.f32.mrf.mxu2  ;;  %v1102_v20 = vpop.f32.mrf.mxu3 }
 0x141   :  { %v1090_v19 = vadd.f32 %v1089_v17, %v1077_v13  ;;  %v3265_v13 = vld [vmem:[#allocation6 + $0x168] sm:$0xf]  ;;  %v3951_v17 = vld [vmem:[#allocation6 + $0x304] sm:$0xf] }
 0x142   :  { %2103 = vmatpush.bf16.msrb.mxu0 %v3170_v11  ;;  %2093 = vmatpush.bf16.msra.mxu3 %v3502_v55  ;;  %v3090_v11 = vor.u32 %v3858_v61, %v3089_v60  ;;  %v3470_v23 = vor.u32 %v3951_v17, %v3467_v18  ;;  %v3218_v60 = vor.u32 %v3890_v49, %v3217_v48  ;;  %v357_v61 = vperm.slane %v4241_v57, 3  ;;  %v3908_v17 = vld [vmem:[#allocation6 + $0x1ac] sm:$0xf]  ;;  %v3299_v18 = vld [vmem:[#allocation6 + $0x1b8] sm:$0xf0] }
 0x143   :  { %v1103_v40 = vadd.f32 %v1102_v20, %v1090_v19  ;;  %v3950_v20 = vld [vmem:[#allocation6 + $0x2f4] sm:$0xf0] }
 0x144   :  { %v3458_v25 = vor.u32 %v3950_v20, %v3457_v16 }
 0x145   :  { %v1115_v27 = vpop.f32.mrf.mxu0  ;;  %v1211_v29 = vmax.f32 %v1103_v40, 0.0  ;;  %v1128_v30 = vpop.f32.mrf.mxu1  ;;  %v3266_v40 = vor.u32 %v3902_v14, %v3265_v13  ;;  %v3930_v13 = vld [vmem:[#allocation6 + $0x254] sm:$0xf0]  ;;  %v3860_v14 = vld [vmem:[#allocation6 + $0x2c] sm:$0xf] }
 0x146   :  { %2104 = vmatpush.bf16.msrb.mxu0 %v3154_v21  ;;  %v1116_v52 = vadd.f32 %v1115_v27, %v356_v38  ;;  %2094 = vmatpush.bf16.msra.mxu3 %v3486_v6  ;;  %v3880_v21 = vld [vmem:[#allocation6 + $0xcc] sm:$0xf]  ;;  %v3898_v27 = vld [vmem:[#allocation6 + $0x154] sm:$0xf0] }
 0x147   :  { %v4248_v3 = vpack.c.bf16 %v1211_v29, %v1211_v29  ;;  %v3190_v45 = vor.u32 %v3880_v21, %v3187_v22  ;;  %v3250_v35 = vor.u32 %v3898_v27, %v3249_v26  ;;  %v3894_v38 = vld [vmem:[#allocation6 + $0x134] sm:$0xf0]  ;;  %v3912_v6 = vld [vmem:[#allocation6 + $0x1cc] sm:$0xf]  ;;  %v3361_v22 = vld [vmem:[#allocation6 + $0x228] sm:$0xf] }
 0x148   :  { %v1091_v39 = vpop.f32.mrf.mxu2  ;;  %v1104_v42 = vpop.f32.mrf.mxu3  ;;  %v1129_v2 = vadd.f32 %v1128_v30, %v1116_v52  ;;  %v3946_v30 = vld [vmem:[#allocation6 + $0x2d4] sm:$0xf0]  ;;  %v3868_v52 = vld [vmem:[#allocation6 + $0x6c] sm:$0xf] }
 0x149   :  { %2018 = vmatmul.bf16.vlgmr.msrb.gmra.mxu1 %v4248_v3  ;;  %2057 = vmatmul.bf16.vlgmr.msra.gmra.mxu0 %v4245_v53  ;;  %v3442_v36 = vor.u32 %v3946_v30, %v3441_v28  ;;  %v3425_v39 = vld [vmem:[#allocation6 + $0x2a8] sm:$0xf]  ;;  %v3872_v42 = vld [vmem:[#allocation6 + $0x8c] sm:$0xf]  ;;  %v3283_v28 = vld [vmem:[#allocation6 + $0x198] sm:$0xf0] }
 0x14a   :  { %2105 = vmatpush.bf16.msrb.mxu0 %v3138_v31  ;;  %2114 = vmatpush.bf16.msrb.mxu1 %v3330_v32  ;;  %v3876_v31 = vld [vmem:[#allocation6 + $0xac] sm:$0xf]  ;;  %v3171_v32 = vld [vmem:[#allocation6 + $0xb8] sm:$0xf0]  ;;  %v3426_v46 = vor.u32 %v3942_v41, %v3425_v39 }
 0x14b   :  { %2095 = vmatpush.bf16.msra.mxu3 %v3470_v23  ;;  %v3174_v37 = vor.u32 %v3876_v31, %v3171_v32  ;;  %v3904_v27 = vld [vmem:[#allocation6 + $0x18c] sm:$0xf]  ;;  %v3267_v41 = vld [vmem:[#allocation6 + $0x178] sm:$0xf0] }
 0x14c   :  { %v3900_v39 = vld [vmem:[#allocation6 + $0x16c] sm:$0xf] }
 0x14d   :  { %v1117_v54 = vpop.f32.mrf.mxu0  ;;  %v1130_v56 = vpop.f32.mrf.mxu1  ;;  %v3270_v49 = vor.u32 %v3900_v39, %v3267_v41  ;;  %v3587_v39 = vld [vmem:[#allocation6 + $0x3f8] sm:$0xf0] }
 0x14e   :  { %2106 = vmatpush.bf16.msrb.mxu0 %v3122_v43  ;;  %2115 = vmatpush.bf16.msrb.mxu1 %v3314_v44  ;;  %v3155_v43 = vld [vmem:[#allocation6 + $0x98] sm:$0xf0]  ;;  %v3234_v44 = vor.u32 %v3894_v38, %v3233_v9  ;;  %v3916_v56 = vld [vmem:[#allocation6 + $0x1ec] sm:$0xf]  ;;  %v3585_v9 = vld [vmem:[#allocation6 + $0x3e8] sm:$0xf] }
 0x14f   :  { %v3158_v47 = vor.u32 %v3872_v42, %v3155_v43  ;;  %v3139_v54 = vld [vmem:[#allocation6 + $0x78] sm:$0xf0]  ;;  %v3982_v38 = vld [vmem:[#allocation6 + $0x3f4] sm:$0xf0]  ;;  %v3948_v42 = vld [vmem:[#allocation6 + $0x2ec] sm:$0xf] }
 0x150   :  { %v1141_v7 = vpop.f32.mrf.mxu2  ;;  %v1154_v8 = vpop.f32.mrf.mxu3  ;;  %v3142_v63 = vor.u32 %v3868_v52, %v3139_v54  ;;  %v3459_v43 = vld [vmem:[#allocation6 + $0x2f8] sm:$0xf0]  ;;  %v3978_v52 = vld [vmem:[#allocation6 + $0x3d4] sm:$0xf0]  ;;  %v3896_v54 = vld [vmem:[#allocation6 + $0x14c] sm:$0xf] }
 0x151   :  { %v1142_v10 = vadd.f32 %v1141_v7, %v1129_v2  ;;  %v3934_v2 = vld [vmem:[#allocation6 + $0x274] sm:$0xf0]  ;;  %v3315_v7 = vld [vmem:[#allocation6 + $0x1d8] sm:$0xf0]  ;;  %v3462_v50 = vor.u32 %v3948_v42, %v3459_v43  ;;  %v3976_v43 = vld [vmem:[#allocation6 + $0x3cc] sm:$0xf] }
 0x152   :  { %2107 = vmatpush.bf16.msrb.mxu0 %v3106_v58  ;;  %2116 = vmatpush.bf16.msrb.mxu1 %v3298_v59  ;;  %v3331_v58 = vld [vmem:[#allocation6 + $0x1f8] sm:$0xf0]  ;;  %v3318_v57 = vor.u32 %v3912_v6, %v3315_v7 }
 0x153   :  { %v1155_v19 = vadd.f32 %v1154_v8, %v1142_v10  ;;  %v3334_v1 = vor.u32 %v3916_v56, %v3331_v58  ;;  %v3394_v8 = vor.u32 %v3934_v2, %v3393_v0  ;;  %v3126_v10 = vor.u32 %v3864_v4, %v3123_v5  ;;  %v3251_v56 = vld [vmem:[#allocation6 + $0x158] sm:$0xf0]  ;;  %v3944_v58 = vld [vmem:[#allocation6 + $0x2cc] sm:$0xf]  ;;  %v3553_v0 = vld [vmem:[#allocation6 + $0x3a8] sm:$0xf] }
 0x154   :  { %v3892_v2 = vld [vmem:[#allocation6 + $0x12c] sm:$0xf]  ;;  %v3235_v4 = vld [vmem:[#allocation6 + $0x138] sm:$0xf0] }
 0x155   :  { %v1212_v24 = vmax.f32 %v1155_v19, 0.0  ;;  %v3940_v5 = vld [vmem:[#allocation6 + $0x2ac] sm:$0xf]  ;;  %v3427_v6 = vld [vmem:[#allocation6 + $0x2b8] sm:$0xf0] }
 0x156   :  { %2108 = vmatpush.bf16.msrb.mxu0 %v3090_v11  ;;  %2117 = vmatpush.bf16.msrb.mxu1 %v3282_v12  ;;  %v3377_v11 = vld [vmem:[#allocation6 + $0x248] sm:$0xf] }
 0x157   :  { %v4253_v29 = vpack.c.bf16 %v1212_v24, %v1212_v24  ;;  %v3378_v20 = vor.u32 %v3930_v13, %v3377_v11  ;;  %v3302_v24 = vor.u32 %v3908_v17, %v3299_v18  ;;  %v3970_v11 = vld [vmem:[#allocation6 + $0x394] sm:$0xf0]  ;;  %v3936_v13 = vld [vmem:[#allocation6 + $0x28c] sm:$0xf]  ;;  %v3521_v18 = vld [vmem:[#allocation6 + $0x368] sm:$0xf] }
 0x158   :  { %v1143_v33 = vpop.f32.mrf.mxu2  ;;  %v1156_v34 = vpop.f32.mrf.mxu3 }
 0x159   :  { %2070 = vmatmul.bf16.vlgmr.msra.gmra.mxu1 %v4248_v3  ;;  %2109 = vmatmul.bf16.vlgmr.msrb.gmra.mxu0 %v4245_v53  ;;  %v3345_v34 = vld [vmem:[#allocation6 + $0x208] sm:$0xf] }
 0x15a   :  { %2153 = vmatpush.bf16.msra.mxu0 %v3206_v15  ;;  %2031 = vmatmul.bf16.vlgmr.msrb.gmra.mxu2 %v4253_v29  ;;  %v3107_v15 = vld [vmem:[#allocation6 + $0x38] sm:$0xf0] }
 0x15b   :  { %2118 = vmatpush.bf16.msrb.mxu1 %v3266_v40  ;;  %2127 = vmatpush.bf16.msrb.mxu2 %v3458_v25  ;;  %v3110_v21 = vor.u32 %v3860_v14, %v3107_v15  ;;  %v3926_v40 = vld [vmem:[#allocation6 + $0x234] sm:$0xf0]  ;;  %v3856_v25 = vld [vmem:[#allocation6 + $0xc] sm:$0xf]  ;;  %v3411_v14 = vld [vmem:[#allocation6 + $0x298] sm:$0xf0] }
 0x15c   :  { %v3362_v32 = vor.u32 %v3926_v40, %v3361_v22  ;;  %v3414_v17 = vor.u32 %v3936_v13, %v3411_v14  ;;  %v3962_v40 = vld [vmem:[#allocation6 + $0x354] sm:$0xf0] }
 0x15d   :  { %v3986_v13 = vld [vmem:[#allocation7 + $0x18] sm:$0xff] }
 0x15e   :  { %2154 = vmatpush.bf16.msra.mxu0 %v3190_v45  ;;  %v3091_v45 = vld [vmem:[#allocation6 + $0x18] sm:$0xf0] }
 0x15f   :  { %2119 = vmatpush.bf16.msrb.mxu1 %v3250_v35  ;;  %2128 = vmatpush.bf16.msrb.mxu2 %v3442_v36  ;;  %v3094_v33 = vor.u32 %v3856_v25, %v3091_v45  ;;  %v3922_v35 = vld [vmem:[#allocation6 + $0x214] sm:$0xf0]  ;;  %v3928_v25 = vld [vmem:[#allocation6 + $0x24c] sm:$0xf]  ;;  %v3379_v45 = vld [vmem:[#allocation6 + $0x258] sm:$0xf0] }
 0x160   :  { %v3998_v14 = vld [vmem:[#allocation7 + $0x78] sm:$0xff] }
 0x162   :  { %2155 = vmatpush.bf16.msra.mxu0 %v3174_v37  ;;  %v3286_v37 = vor.u32 %v3904_v27, %v3283_v28  ;;  %v3382_v27 = vor.u32 %v3928_v25, %v3379_v45  ;;  %v3489_v28 = vld [vmem:[#allocation6 + $0x328] sm:$0xf]  ;;  %v4006_v25 = vld [vmem:[#allocation7 + $0xb8] sm:$0xff]  ;;  %v3993_v45 = vld [vmem:[#allocation7 + $0x50] sm:$0xff] }
 0x163   :  { %2120 = vmatpush.bf16.msrb.mxu1 %v3234_v44  ;;  %2129 = vmatpush.bf16.msrb.mxu2 %v3426_v46  ;;  %v3346_v46 = vor.u32 %v3922_v35, %v3345_v34  ;;  %v3473_v35 = vld [vmem:[#allocation6 + $0x308] sm:$0xf] }
 0x165   :  { %v1167_v55 = vpop.f32.mrf.mxu0  ;;  %v1180_v59 = vpop.f32.mrf.mxu1 }
 0x166   :  { %2156 = vmatpush.bf16.msra.mxu0 %v3158_v47  ;;  %v1168_v12 = vadd.f32 %v1167_v55, %v357_v61  ;;  %v3586_v47 = vor.u32 %v3982_v38, %v3585_v9  ;;  %v3570_v61 = vor.u32 %v3978_v52, %v3569_v51  ;;  %v3347_v9 = vld [vmem:[#allocation6 + $0x218] sm:$0xf0]  ;;  %v3980_v38 = vld [vmem:[#allocation6 + $0x3ec] sm:$0xf] }
 0x167   :  { %2121 = vmatpush.bf16.msrb.mxu1 %v3218_v60  ;;  %2130 = vmatpush.bf16.msrb.mxu2 %v3410_v62  ;;  %v3254_v62 = vor.u32 %v3896_v54, %v3251_v56  ;;  %v3590_v42 = vor.u32 %v3980_v38, %v3587_v39  ;;  %v3968_v51 = vld [vmem:[#allocation6 + $0x38c] sm:$0xf]  ;;  %v3539_v52 = vld [vmem:[#allocation6 + $0x398] sm:$0xf0]  ;;  %v4001_v38 = vld [vmem:[#allocation7 + $0x90] sm:$0xff] }
 0x168   :  { %v1181_v23 = vadd.f32 %v1180_v59, %v1168_v12  ;;  %v3443_v59 = vld [vmem:[#allocation6 + $0x2d8] sm:$0xf0]  ;;  %v3888_v12 = vld [vmem:[#allocation6 + $0x10c] sm:$0xf]  ;;  %v3542_v54 = vor.u32 %v3968_v51, %v3539_v52  ;;  %v3999_v51 = vld [vmem:[#allocation7 + $0x80] sm:$0xff] }
 0x169   :  { %v3523_v56 = vld [vmem:[#allocation6 + $0x378] sm:$0xf0] }
 0x16a   :  { %2157 = vmatpush.bf16.msra.mxu0 %v3142_v63  ;;  %2122 = vmatmul.bf16.vlgmr.msrb.gmra.mxu1 %v4248_v3  ;;  %v3446_v63 = vor.u32 %v3944_v58, %v3443_v59  ;;  %v3960_v59 = vld [vmem:[#allocation6 + $0x34c] sm:$0xf]  ;;  %v4014_v52 = vld [vmem:[#allocation7 + $0xf8] sm:$0xff] }
 0x16b   :  { %2166 = vmatpush.bf16.msra.mxu1 %v3334_v1  ;;  %2083 = vmatmul.bf16.vlgmr.msra.gmra.mxu2 %v4253_v29  ;;  %v3974_v1 = vld [vmem:[#allocation6 + $0x3b4] sm:$0xf0] }
 0x16c   :  { %2131 = vmatpush.bf16.msrb.mxu2 %v3394_v8  ;;  %v3554_v7 = vor.u32 %v3974_v1, %v3553_v0  ;;  %v3430_v8 = vor.u32 %v3940_v5, %v3427_v6  ;;  %v3952_v1 = vld [vmem:[#allocation6 + $0x30c] sm:$0xf]  ;;  %v3990_v6 = vld [vmem:[#allocation7 + $0x38] sm:$0xff] }
 0x16d   :  { %v1169_v16 = vpop.f32.mrf.mxu0  ;;  %v1182_v19 = vpop.f32.mrf.mxu1 }
 0x16e   :  { %2158 = vmatpush.bf16.msra.mxu0 %v3126_v10  ;;  %v3537_v10 = vld [vmem:[#allocation6 + $0x388] sm:$0xf]  ;;  %v3966_v19 = vld [vmem:[#allocation6 + $0x374] sm:$0xf0] }
 0x16f   :  { %2167 = vmatpush.bf16.msra.mxu1 %v3318_v57  ;;  %v3219_v57 = vld [vmem:[#allocation6 + $0x118] sm:$0xf0]  ;;  %v3538_v15 = vor.u32 %v3970_v11, %v3537_v10  ;;  %v3522_v22 = vor.u32 %v3966_v19, %v3521_v18  ;;  %v3988_v10 = vld [vmem:[#allocation7 + $0x28] sm:$0xff]  ;;  %v3987_v11 = vld [vmem:[#allocation7 + $0x20] sm:$0xff] }
 0x170   :  { %v1193_v26 = vpop.f32.mrf.mxu2  ;;  %v1206_v31 = vpop.f32.mrf.mxu3  ;;  %2132 = vmatpush.bf16.msrb.mxu2 %v3378_v20  ;;  %v3222_v16 = vor.u32 %v3888_v12, %v3219_v57  ;;  %v3932_v20 = vld [vmem:[#allocation6 + $0x26c] sm:$0xf] }
 0x171   :  { %v1194_v30 = vadd.f32 %v1193_v26, %v1181_v23  ;;  %v3984_v18 = vld [vmem:[#allocation7 + $0x8] sm:$0xff] }
 0x172   :  { %2159 = vmatpush.bf16.msra.mxu0 %v3110_v21  ;;  %v3395_v21 = vld [vmem:[#allocation6 + $0x278] sm:$0xf0]  ;;  %v3996_v19 = vld [vmem:[#allocation7 + $0x68] sm:$0xff] }
 0x173   :  { %v1207_v36 = vadd.f32 %v1206_v31, %v1194_v30  ;;  %2168 = vmatpush.bf16.msra.mxu1 %v3302_v24  ;;  %v3398_v23 = vor.u32 %v3932_v20, %v3395_v21  ;;  %v3505_v24 = vld [vmem:[#allocation6 + $0x348] sm:$0xf]  ;;  %v3958_v30 = vld [vmem:[#allocation6 + $0x334] sm:$0xf0]  ;;  %v3924_v31 = vld [vmem:[#allocation6 + $0x22c] sm:$0xf] }
 0x174   :  { %2133 = vmatpush.bf16.msrb.mxu2 %v3362_v32  ;;  %v3506_v26 = vor.u32 %v3962_v40, %v3505_v24  ;;  %v3363_v32 = vld [vmem:[#allocation6 + $0x238] sm:$0xf0]  ;;  %v3983_v20 = vld [vmem:[#allocation7] sm:$0xff] }
 0x175   :  { %v1213_v44 = vmax.f32 %v1207_v36, 0.0  ;;  %v3366_v34 = vor.u32 %v3924_v31, %v3363_v32  ;;  %v3954_v36 = vld [vmem:[#allocation6 + $0x314] sm:$0xf0]  ;;  %v3995_v21 = vld [vmem:[#allocation7 + $0x60] sm:$0xff]  ;;  %v4004_v31 = vld [vmem:[#allocation7 + $0xa8] sm:$0xff] }
 0x176   :  { %2160 = vmatpush.bf16.msra.mxu0 %v3094_v33  ;;  %v3490_v33 = vor.u32 %v3958_v30, %v3489_v28  ;;  %v3474_v41 = vor.u32 %v3954_v36, %v3473_v35  ;;  %v3994_v40 = vld [vmem:[#allocation7 + $0x58] sm:$0xff]  ;;  %v3992_v30 = vld [vmem:[#allocation7 + $0x48] sm:$0xff]  ;;  %v3991_v32 = vld [vmem:[#allocation7 + $0x40] sm:$0xff] }
 0x177   :  { %v4261_v48 = vpack.c.bf16 %v1213_v44, %v1213_v44  ;;  %2169 = vmatpush.bf16.msra.mxu1 %v3286_v37  ;;  %v3920_v37 = vld [vmem:[#allocation6 + $0x20c] sm:$0xf]  ;;  %v3571_v44 = vld [vmem:[#allocation6 + $0x3d8] sm:$0xf0] }
 0x178   :  { %v1195_v55 = vpop.f32.mrf.mxu2  ;;  %v1208_v60 = vpop.f32.mrf.mxu3  ;;  %2134 = vmatpush.bf16.msrb.mxu2 %v3346_v46  ;;  %v3574_v46 = vor.u32 %v3976_v43, %v3571_v44  ;;  %v4000_v44 = vld [vmem:[#allocation7 + $0x88] sm:$0xff] }
 0x179   :  { %2044 = vmatmul.bf16.vlgmr.msrb.gmra.mxu3 %v4261_v48  ;;  %2161 = vmatmul.bf16.vlgmr.msra.gmra.mxu0 %v4245_v53  ;;  %v3238_v53 = vor.u32 %v3892_v2, %v3235_v4  ;;  %v3964_v55 = vld [vmem:[#allocation6 + $0x36c] sm:$0xf]  ;;  %v3507_v60 = vld [vmem:[#allocation6 + $0x358] sm:$0xf0] }
 0x17a   :  { %2140 = vmatpush.bf16.msrb.mxu3 %v3586_v47  ;;  %v3972_v47 = vld [vmem:[#allocation6 + $0x3ac] sm:$0xf]  ;;  %v3526_v58 = vor.u32 %v3964_v55, %v3523_v56  ;;  %2471 = vmatpush.bf16.msrb.mxu0 %v3990_v6 }
 0x17b   :  { %2170 = vmatpush.bf16.msra.mxu1 %v3270_v49  ;;  %2135 = vmatmul.bf16.vlgmr.msrb.gmra.mxu2 %v4253_v29  ;;  %v3555_v49 = vld [vmem:[#allocation6 + $0x3b8] sm:$0xf0] }
 0x17c   :  { %2179 = vmatpush.bf16.msra.mxu2 %v3462_v50  ;;  %v3558_v50 = vor.u32 %v3972_v47, %v3555_v49 }
 0x17e   :  { %2141 = vmatpush.bf16.msrb.mxu3 %v3570_v61  ;;  %v3510_v61 = vor.u32 %v3960_v59, %v3507_v60  ;;  %v4012_v60 = vld [vmem:[#allocation7 + $0xe8] sm:$0xff] }
 0x17f   :  { %2171 = vmatpush.bf16.msra.mxu1 %v3254_v62  ;;  %v3956_v62 = vld [vmem:[#allocation6 + $0x32c] sm:$0xf] }
 0x180   :  { %2180 = vmatpush.bf16.msra.mxu2 %v3446_v63  ;;  %v3491_v63 = vld [vmem:[#allocation6 + $0x338] sm:$0xf0] }
 0x181   :  { %v3494_v0 = vor.u32 %v3956_v62, %v3491_v63 }
 0x182   :  { %2142 = vmatpush.bf16.msrb.mxu3 %v3554_v7  ;;  %v3989_v7 = vld [vmem:[#allocation7 + $0x30] sm:$0xff] }
 0x183   :  { %2172 = vmatpush.bf16.msra.mxu1 %v3238_v53  ;;  %2472 = vmatpush.bf16.msrb.mxu0 %v3989_v7 }
 0x184   :  { %2181 = vmatpush.bf16.msra.mxu2 %v3430_v8 }
 0x186   :  { %2143 = vmatpush.bf16.msrb.mxu3 %v3538_v15  ;;  %v3997_v15 = vld [vmem:[#allocation7 + $0x70] sm:$0xff] }
 0x187   :  { %2173 = vmatpush.bf16.msra.mxu1 %v3222_v16  ;;  %2473 = vmatpush.bf16.msrb.mxu0 %v3988_v10  ;;  %v4009_v10 = vld [vmem:[#allocation7 + $0xd0] sm:$0xff] }
 0x188   :  { %2182 = vmatpush.bf16.msra.mxu2 %v3414_v17 }
 0x189   :  { %2096 = vmatmul.bf16.vlgmr.msra.gmra.mxu3 %v4261_v48 }
 0x18a   :  { %2144 = vmatpush.bf16.msrb.mxu3 %v3522_v22  ;;  %2174 = vmatmul.bf16.vlgmr.msra.gmra.mxu1 %v4248_v3  ;;  %v3350_v3 = vor.u32 %v3920_v37, %v3347_v9  ;;  %v4002_v9 = vld [vmem:[#allocation7 + $0x98] sm:$0xff] }
 0x18b   :  { %2474 = vmatpush.bf16.msrb.mxu0 %v3987_v11  ;;  %2484 = vmatpush.bf16.msrb.mxu1 %v3998_v14 }
 0x18c   :  { %2183 = vmatpush.bf16.msra.mxu2 %v3398_v23 }
 0x18e   :  { %2145 = vmatpush.bf16.msrb.mxu3 %v3506_v26  ;;  %v4005_v26 = vld [vmem:[#allocation7 + $0xb0] sm:$0xff] }
 0x18f   :  { %2475 = vmatpush.bf16.msrb.mxu0 %v3986_v13  ;;  %2485 = vmatpush.bf16.msrb.mxu1 %v3997_v15 }
 0x190   :  { %2184 = vmatpush.bf16.msra.mxu2 %v3382_v27 }
 0x192   :  { %2146 = vmatpush.bf16.msrb.mxu3 %v3490_v33  ;;  %v4003_v33 = vld [vmem:[#allocation7 + $0xa0] sm:$0xff] }
 0x193   :  { %2486 = vmatpush.bf16.msrb.mxu1 %v3996_v19 }
 0x194   :  { %2185 = vmatpush.bf16.msra.mxu2 %v3366_v34  ;;  %v4279_v34 = vld [vmem:[#allocation9 + $0x2] ss:$4 sm:$0xf] }
 0x195   :  { %v1349_v37 = vperm.slane %v4279_v34, 0  ;;  %v1350_v56 = vperm.slane %v4279_v34, 1  ;;  %v1351_v11 = vperm.slane %v4279_v34, 2 }
 0x196   :  { %2147 = vmatpush.bf16.msrb.mxu3 %v3474_v41 }
 0x197   :  { %2487 = vmatpush.bf16.msrb.mxu1 %v3995_v21 }
 0x198   :  { %2186 = vmatpush.bf16.msra.mxu2 %v3350_v3 }
 0x199   :  { %2148 = vmatmul.bf16.vlgmr.msrb.gmra.mxu3 %v4261_v48 }
 0x19a   :  { %2192 = vmatpush.bf16.msra.mxu3 %v3590_v42 }
 0x19b   :  { %2187 = vmatmul.bf16.vlgmr.msra.gmra.mxu2 %v4253_v29  ;;  %v3475_v29 = vld [vmem:[#allocation6 + $0x318] sm:$0xf0]  ;;  %2488 = vmatpush.bf16.msrb.mxu1 %v3994_v40 }
 0x19c   :  { %v3478_v2 = vor.u32 %v3952_v1, %v3475_v29  ;;  %2497 = vmatpush.bf16.msrb.mxu2 %v4006_v25  ;;  %v4011_v1 = vld [vmem:[#allocation7 + $0xe0] sm:$0xff] }
 0x19e   :  { %2193 = vmatpush.bf16.msra.mxu3 %v3574_v46 }
 0x19f   :  { %2489 = vmatpush.bf16.msrb.mxu1 %v3993_v45 }
 0x1a0   :  { %2498 = vmatpush.bf16.msrb.mxu2 %v4005_v26 }
 0x1a2   :  { %2194 = vmatpush.bf16.msra.mxu3 %v3558_v50 }
 0x1a3   :  { %2490 = vmatpush.bf16.msrb.mxu1 %v3992_v30 }
 0x1a4   :  { %2499 = vmatpush.bf16.msrb.mxu2 %v4004_v31 }
 0x1a6   :  { %2195 = vmatpush.bf16.msra.mxu3 %v3542_v54 }
 0x1a7   :  { %2491 = vmatpush.bf16.msrb.mxu1 %v3991_v32 }
 0x1a8   :  { %2500 = vmatpush.bf16.msrb.mxu2 %v4003_v33 }
 0x1aa   :  { %2196 = vmatpush.bf16.msra.mxu3 %v3526_v58  ;;  %v4013_v58 = vld [vmem:[#allocation7 + $0xf0] sm:$0xff] }
 0x1ac   :  { %2501 = vmatpush.bf16.msrb.mxu2 %v4002_v9 }
 0x1ae   :  { %2197 = vmatpush.bf16.msra.mxu3 %v3510_v61 }
 0x1b0   :  { %2502 = vmatpush.bf16.msrb.mxu2 %v4001_v38 }
 0x1b2   :  { %2198 = vmatpush.bf16.msra.mxu3 %v3494_v0 }
 0x1b4   :  { %2503 = vmatpush.bf16.msrb.mxu2 %v4000_v44 }
 0x1b6   :  { %2199 = vmatpush.bf16.msra.mxu3 %v3478_v2  ;;  %v2006_v4 = vpop.f32.mrf.mxu0 }
 0x1b7   :  { %v2007_v41 = vadd.f32 %v2006_v4, %v1349_v37  ;;  %v4024_v37 = vld [vmem:[#allocation9 + $0x3] ss:$0 sm:$0xff] }
 0x1b8   :  { %2504 = vmatpush.bf16.msrb.mxu2 %v3999_v51 }
 0x1b9   :  { %2200 = vmatmul.bf16.vlgmr.msra.gmra.mxu3 %v4261_v48  ;;  %v3985_v48 = vld [vmem:[#allocation7 + $0x10] sm:$0xff] }
 0x1ba   :  { %2476 = vmatpush.bf16.msrb.mxu0 %v3985_v48  ;;  %2510 = vmatpush.bf16.msrb.mxu3 %v4014_v52  ;;  %v4007_v48 = vld [vmem:[#allocation7 + $0xc0] sm:$0xff] }
 0x1be   :  { %v2008_v5 = vpop.f32.mrf.mxu0  ;;  %2477 = vmatpush.bf16.msrb.mxu0 %v3984_v18  ;;  %2511 = vmatpush.bf16.msrb.mxu3 %v4013_v58 }
 0x1bf   :  { %v4010_v5 = vld [vmem:[#allocation7 + $0xd8] sm:$0xff] }
 0x1c2   :  { %2478 = vmatpush.bf16.msrb.mxu0 %v3983_v20  ;;  %2512 = vmatpush.bf16.msrb.mxu3 %v4012_v60 }
 0x1c6   :  { %v2019_v53 = vpop.f32.mrf.mxu1  ;;  %v4271_v8 = vpop.f32.mrf.mxu0  ;;  %2513 = vmatpush.bf16.msrb.mxu3 %v4011_v1 }
 0x1c7   :  { %v2020_v42 = vadd.f32 %v2019_v53, %v2007_v41  ;;  %v2059_v61 = vadd.f32 %v4271_v8, %v1350_v56 }
 0x1ca   :  { %2514 = vmatpush.bf16.msrb.mxu3 %v4010_v5 }
 0x1ce   :  { %v2021_v12 = vpop.f32.mrf.mxu1  ;;  %v2060_v57 = vpop.f32.mrf.mxu0  ;;  %2515 = vmatpush.bf16.msrb.mxu3 %v4009_v10 }
 0x1cf   :  { %v4008_v57 = vld [vmem:[#allocation7 + $0xc8] sm:$0xff] }
 0x1d2   :  { %2516 = vmatpush.bf16.msrb.mxu3 %v4008_v57 }
 0x1d6   :  { %v4273_v16 = vpop.f32.mrf.mxu1  ;;  %v4275_v17 = vpop.f32.mrf.mxu0  ;;  %2517 = vmatpush.bf16.msrb.mxu3 %v4007_v48 }
 0x1d7   :  { %v2072_v0 = vadd.f32 %v4273_v16, %v2059_v61  ;;  %v2111_v12 = vadd.f32 %v4275_v17, %v1351_v11 }
 0x1dd   :  { %v2032_v22 = vpop.f32.mrf.mxu2 }
 0x1de   :  { %v2073_v23 = vpop.f32.mrf.mxu1  ;;  %v2112_v24 = vpop.f32.mrf.mxu0  ;;  %v2033_v43 = vadd.f32 %v2032_v22, %v2020_v42 }
 0x1df   :  { %v1352_v23 = vperm.slane %v4279_v34, 3 }
 0x1e5   :  { %v2034_v27 = vpop.f32.mrf.mxu2 }
 0x1e7   :  { %v4277_v28 = vpop.f32.mrf.mxu1 }
 0x1e8   :  { %v2124_v13 = vadd.f32 %v4277_v28, %v2111_v12 }
 0x1ee   :  { %v2084_v35 = vpop.f32.mrf.mxu2 }
 0x1ef   :  { %v2125_v36 = vpop.f32.mrf.mxu1  ;;  %v2085_v29 = vadd.f32 %v2084_v35, %v2072_v0 }
 0x1f6   :  { %v2162_v39 = vpop.f32.mrf.mxu0  ;;  %v2086_v3 = vpop.f32.mrf.mxu2 }
 0x1f7   :  { %v2163_v24 = vadd.f32 %v2162_v39, %v1352_v23 }
 0x1fc   :  { %v2045_v46 = vpop.f32.mrf.mxu3 }
 0x1fd   :  { %v2046_v47 = vadd.f32 %v2045_v46, %v2033_v43 }
 0x1fe   :  { %v2164_v49 = vpop.f32.mrf.mxu0  ;;  %v2136_v54 = vpop.f32.mrf.mxu2 }
 0x1ff   :  { %v2205_v50 = vmax.f32 %v2046_v47, 0.0  ;;  %v2137_v14 = vadd.f32 %v2136_v54, %v2124_v13 }
 0x201   :  { %v2209_v55 = vpack.c.bf16 %v2205_v50, %v2205_v50 }
 0x203   :  { %2479 = vmatmul.bf16.vlgmr.msrb.gmra.mxu0 %v2209_v55 }
 0x204   :  { %v2047_v59 = vpop.f32.mrf.mxu3 }
 0x206   :  { %v2138_v63 = vpop.f32.mrf.mxu2 }
 0x207   :  { %v2175_v62 = vpop.f32.mrf.mxu1 }
 0x208   :  { %v2176_v40 = vadd.f32 %v2175_v62, %v2163_v24 }
 0x20c   :  { %v2097_v2 = vpop.f32.mrf.mxu3 }
 0x20d   :  { %v2098_v4 = vadd.f32 %v2097_v2, %v2085_v29 }
 0x20f   :  { %v2206_v6 = vmax.f32 %v2098_v4, 0.0  ;;  %v2177_v7 = vpop.f32.mrf.mxu1 }
 0x211   :  { %v2210_v53 = vpack.c.bf16 %v2206_v6, %v2206_v6 }
 0x213   :  { %2492 = vmatmul.bf16.vlgmr.msrb.gmra.mxu1 %v2210_v53 }
 0x214   :  { %v2099_v8 = vpop.f32.mrf.mxu3 }
 0x21c   :  { %v2149_v15 = vpop.f32.mrf.mxu3 }
 0x21d   :  { %v2150_v16 = vadd.f32 %v2149_v15, %v2137_v14 }
 0x21e   :  { %v2188_v18 = vpop.f32.mrf.mxu2 }
 0x21f   :  { %v2207_v19 = vmax.f32 %v2150_v16, 0.0  ;;  %v2189_v17 = vadd.f32 %v2188_v18, %v2176_v40 }
 0x221   :  { %v2211_v20 = vpack.c.bf16 %v2207_v19, %v2207_v19 }
 0x223   :  { %2505 = vmatmul.bf16.vlgmr.msrb.gmra.mxu2 %v2211_v20 }
 0x224   :  { %v2151_v21 = vpop.f32.mrf.mxu3 }
 0x226   :  { %v2190_v22 = vpop.f32.mrf.mxu2 }
 0x23c   :  { %v2201_v25 = vpop.f32.mrf.mxu3 }
 0x23d   :  { %v2202_v45 = vadd.f32 %v2201_v25, %v2189_v17 }
 0x23f   :  { %v2208_v26 = vmax.f32 %v2202_v45, 0.0 }
 0x241   :  { %v2212_v27 = vpack.c.bf16 %v2208_v26, %v2208_v26 }
 0x243   :  { %2518 = vmatmul.bf16.vlgmr.msrb.gmra.mxu3 %v2212_v27 }
 0x244   :  { %v2203_v28 = vpop.f32.mrf.mxu3 }
 0x280   :  { %v2480_v30 = vpop.f32.mrf.mxu0 }
 0x281   :  { %v2481_v9 = vadd.f32 %v4024_v37, %v2480_v30 }
 0x288   :  { %v2482_v31 = vpop.f32.mrf.mxu0 }
 0x290   :  { %v2493_v32 = vpop.f32.mrf.mxu1 }
 0x291   :  { %v2494_v38 = vadd.f32 %v2493_v32, %v2481_v9 }
 0x298   :  { %v2495_v33 = vpop.f32.mrf.mxu1 }
 0x2a6   :  { %v2506_v35 = vpop.f32.mrf.mxu2 }
 0x2a7   :  { %v2507_v41 = vadd.f32 %v2506_v35, %v2494_v38 }
 0x2ae   :  { %v2508_v36 = vpop.f32.mrf.mxu2 }
 0x2c6   :  { %v2519_v34 = vpop.f32.mrf.mxu3 }
 0x2c7   :  { %v2520_v39 = vadd.f32 %v2519_v34, %v2507_v41 }
 0x2c9   :  { %2523 = vst [vmem:[%s4298_s6] sm:$0xff] %v2520_v39 }
 0x2ce   :  { %v2521_v3 = vpop.f32.mrf.mxu3 }
 0x2cf   :  { %2528 = vsyncpa [#allocation3], 1 }
 0x2d0   :  { %2529 = vsyncpa [#allocation5], 1 }
 0x2d1   :  { %2530 = vsyncpa [#allocation8], 1 }

</bundles_post_ra>
